<compile_context>
chip_gen: v5e
topology: v5e:2x2
jax: 0.10.0
libtpu: 0.0.40
codegen_flags: <defaults>
</compile_context>

<pallas_src>
import functools

import jax
import jax.numpy as jnp
import numpy as np
from jax import lax
from jax.experimental import pallas as pl
from jax.experimental.pallas import tpu as pltpu

EPS_BN = 1e-5
EPS_LN = 1e-5

# Geometry: img_res=64 -> sub_img_res=32 so the backbone flattens to exactly 256 features.
SUB = 32
DEPTH = 4                      # depth patches; Conv3d kernel depth is 1
K1, S1, C0, C1 = 7, 3, 3, 16   # conv1: 3->16, k7, s3
K2, S2, C2 = 5, 2, 32          # conv2: 16->32, k5, s2
K3, S3, C3 = 3, 1, 64          # conv3: 32->64, k3, s1
OH1 = (SUB - K1) // S1 + 1     # 9
OH2 = (OH1 - K2) // S2 + 1     # 3
OH3 = (OH2 - K3) // S3 + 1     # 1
assert C3 * DEPTH * OH3 * OH3 == 256

KROW1 = SUB * C0               # 96   rows per conv1 weight block (= x lane width)
KROW2 = OH1 * C1               # 144  rows per conv2 weight block (= h1 lane width)
KROW3 = OH2 * C2               # 96   rows per conv3 weight block (= h2 lane width)

# conv1 host-side pre-gather taps (static): input row h = S1*oh + i
_TAPS1 = S1 * np.arange(OH1)[:, None] + np.arange(K1)[None, :]      # (OH1, K1)

# packed small-vector array: one row per vector, lanes 0..width-1 valid
_VEC_W = 144
(_V_B1, _V_G1, _V_BE1,
 _V_B2, _V_G2, _V_BE2,
 _V_B3, _V_HB1, _V_HB2,
 _V_LNG, _V_LNB, _V_HB3, _V_HB4) = range(13)
_VEC_ROWS = 13


# ------------------------------ fused kernel ---------------------------------

def _rep(v, times):
    """Repeat a (1, width) row `times` times along lanes -> (1, width*times)."""
    return jnp.concatenate([v] * times, axis=1) if times > 1 else v


def _fused_kernel(xg_ref, w1_ref, w2_ref, w3_ref, f1_ref, f2_ref,
                  hw1_ref, hw2_ref, hw3_ref, hw4_ref, vec_ref,
                  o_ref, *, n):
    """Whole PolicyNet forward for n images (B = n*DEPTH depth slices).

    Layouts (all 2-D, VMEM resident):
      xg  : (OH1*B, K1*KROW1)  row = oh*B + b, col = i*KROW1 + w*C0 + c   (b = d*n + img)
      h1  : (OH1*B, OH1*C1)    row = oh*B + b, col = ow*C1 + c
      h2  : (OH2*B, OH2*C2)    row = oh*B + b, col = ow*C2 + c
      feat: (B, C3)
    """
    B = n * DEPTH

    def vrow(r, width):                      # small packed-vector loads (lane 0 aligned)
        return vec_ref[r:r + 1, :width]

    def mm(a, w_ref):
        # bf16 MXU inputs, f32 accumulation; all non-matmul math stays f32.
        return jnp.dot(a.astype(jnp.bfloat16), w_ref[...],
                       preferred_element_type=jnp.float32)

    def batchnorm(h, fold_ref, groups, width, count, gamma, beta):
        # One-pass stats; per-ow lane groups folded to per-channel on the MXU.
        stats = jnp.concatenate(
            [jnp.sum(h, axis=0, keepdims=True),
             jnp.sum(h * h, axis=0, keepdims=True)], axis=0)          # (2, groups*width)
        folded = jnp.dot(stats, fold_ref[...],
                         preferred_element_type=jnp.float32) * (1.0 / count)  # (2, width)
        mean = folded[0:1, :]
        var = folded[1:2, :] - mean * mean                            # E[x^2] - mean^2
        scale = gamma * lax.rsqrt(var + EPS_BN)
        shift = beta - mean * scale
        return h * _rep(scale, groups) + _rep(shift, groups)

    # ---- Conv3d(3,16,(1,7,7),s=(1,3,3)) -> ReLU -> BatchNorm3d(16) ----
    # conv1 taps were pre-gathered on the host: ONE (OH1*B,672)@(672,144) MXU pass.
    h = jnp.dot(xg_ref[...], w1_ref[...], preferred_element_type=jnp.float32)
    h = jnp.maximum(h + vrow(_V_B1, OH1 * C1), 0.0)
    h1 = batchnorm(h, f1_ref, OH1, C1, float(OH1 * OH1 * B),
                   vrow(_V_G1, C1), vrow(_V_BE1, C1))                 # (72, 144) f32

    # ---- Conv3d(16,32,(1,5,5),s=(1,2,2)) -> ReLU -> BatchNorm3d(32) ----
    # Gather kh taps into lanes -> single K=720 matmul (in-place MXU accumulation).
    g2 = jnp.concatenate(
        [jnp.concatenate([h1[(S2 * oh + i) * B:(S2 * oh + i + 1) * B, :]
                          for i in range(K2)], axis=1)
         for oh in range(OH2)], axis=0)                               # (24, 720) f32
    h = jnp.maximum(mm(g2, w2_ref) + vrow(_V_B2, OH2 * C2), 0.0)
    h2 = batchnorm(h, f2_ref, OH2, C2, float(OH2 * OH2 * B),
                   vrow(_V_G2, C2), vrow(_V_BE2, C2))                 # (24, 96) f32

    # ---- Conv3d(32,64,(1,3,3),s=1) -> ReLU  (output spatial is 1x1) ----
    g3 = jnp.concatenate([h2[i * B:(i + 1) * B, :] for i in range(K3)], axis=1)  # (8, 288)
    feat = jnp.maximum(mm(g3, w3_ref) + vrow(_V_B3, C3), 0.0)         # (B, 64), b = d*n+img

    # ---- head: Linear(256,128)+ReLU, Linear(128,64)+ReLU, LayerNorm(64),
    #            Linear(64,32)+ReLU, Linear(32,4) ----
    # Depth row-blocks concatenated along lanes -> one K=256 dot (torch Flatten order is
    # folded into hw1's host-side row permutation).
    fcat = jnp.concatenate([feat[d * n:(d + 1) * n, :] for d in range(DEPTH)], axis=1)
    h = jnp.maximum(mm(fcat, hw1_ref) + vrow(_V_HB1, 128), 0.0)
    h = jnp.maximum(mm(h, hw2_ref) + vrow(_V_HB2, 64), 0.0)
    mu = jnp.mean(h, axis=-1, keepdims=True)
    var = jnp.mean(jnp.square(h - mu), axis=-1, keepdims=True)
    h = (h - mu) * lax.rsqrt(var + EPS_LN)
    h = h * vrow(_V_LNG, 64) + vrow(_V_LNB, 64)
    h = jnp.maximum(mm(h, hw3_ref) + vrow(_V_HB3, 32), 0.0)
    o_ref[...] = mm(h, hw4_ref) + vrow(_V_HB4, 4)


# ------------------------------ JAX wrapper -----------------------------------

def _vmem_specs(k):
    return [pl.BlockSpec(memory_space=pltpu.MemorySpace.VMEM) for _ in range(k)]


def policy_net_forward(state, pk):
    """state: (N, 3, DEPTH, SUB, SUB) — the 'prepared' state."""
    n, c0, depth, h, w = state.shape
    assert (c0, depth, h, w) == (C0, DEPTH, SUB, SUB), state.shape
    B = n * depth

    # Single fused transpose + conv1 im2col pre-gather (kh taps into lanes), sent as bf16.
    # b = d*n + img (depth-major); row = oh*B + b; col = i*KROW1 + w*C0 + c.
    x = state.transpose(3, 2, 0, 4, 1).reshape(SUB, B, SUB * C0)       # (H, B, KROW1)
    xg = x[_TAPS1]                                                      # (OH1, K1, B, KROW1)
    xg = xg.transpose(0, 2, 1, 3).reshape(OH1 * B, K1 * KROW1).astype(jnp.bfloat16)

    kernel = functools.partial(_fused_kernel, n=n)
    return pl.pallas_call(
        kernel,
        out_shape=jax.ShapeDtypeStruct((n, 4), jnp.float32),
        in_specs=_vmem_specs(11),
        out_specs=pl.BlockSpec(memory_space=pltpu.MemorySpace.VMEM),
    )(xg,
      pk["w1b"], pk["w2b"], pk["w3b"], pk["f1"], pk["f2"],
      pk["hw1"], pk["hw2"], pk["hw3"], pk["hw4"], pk["vecs"])


# -------------------------- one-time parameter repack -------------------------

def prepare_packed_params(p):
    """Repack torch-layout params into kernel-friendly matrices (done once).

    Conv weights become block-banded matrices (kw + stride folded in) so each conv is a
    single matmul in-kernel; the torch Flatten order is folded into a row permutation of
    hw1; BN lane-fold matrices and a single packed small-vector array are prebuilt.
    """
    f32 = np.float32
    w1 = np.asarray(p["w1"], f32)        # (C1, C0, K1, K1)
    w2 = np.asarray(p["w2"], f32)        # (C2, C1, K2, K2)
    w3 = np.asarray(p["w3"], f32)        # (C3, C2, K3, K3)

    w1b = np.zeros((K1, KROW1, OH1 * C1), f32)
    for i in range(K1):
        for ow in range(OH1):
            for j in range(K1):
                col = S1 * ow + j
                w1b[i, col * C0:(col + 1) * C0, ow * C1:(ow + 1) * C1] = w1[:, :, i, j].T

    w2b = np.zeros((K2, KROW2, OH2 * C2), f32)
    for i in range(K2):
        for ow in range(OH2):
            for j in range(K2):
                col = S2 * ow + j
                w2b[i, col * C1:(col + 1) * C1, ow * C2:(ow + 1) * C2] = w2[:, :, i, j].T

    w3b = np.zeros((K3, KROW3, C3), f32)
    for i in range(K3):
        for j in range(K3):
            w3b[i, j * C2:(j + 1) * C2, :] = w3[:, :, i, j].T

    # BN lane-fold matrices: F[ow*C + c, c] = 1 (per-ow group sums -> per-channel on MXU).
    f1 = np.zeros((OH1 * C1, C1), f32)
    for ow in range(OH1):
        f1[ow * C1:(ow + 1) * C1, :] = np.eye(C1, dtype=f32)
    f2 = np.zeros((OH2 * C2, C2), f32)
    for ow in range(OH2):
        f2[ow * C2:(ow + 1) * C2, :] = np.eye(C2, dtype=f32)

    # torch Flatten on (N, C3, DEPTH, 1, 1) orders features (c, d); kernel feature lanes
    # are depth-major (d*C3 + c), so permute hw1 rows: new row d*C3+c <- old row c*DEPTH+d.
    perm = np.array([(r % C3) * DEPTH + r // C3 for r in range(C3 * DEPTH)])
    hw1p = np.asarray(p["hw1"], f32)[perm]

    # All small per-channel / bias vectors packed into one (13,144) f32 array (one DMA).
    vecs = np.zeros((_VEC_ROWS, _VEC_W), f32)
    vecs[_V_B1, :OH1 * C1] = np.tile(np.asarray(p["b1"], f32), OH1)
    vecs[_V_G1, :C1] = np.asarray(p["g1"], f32)
    vecs[_V_BE1, :C1] = np.asarray(p["be1"], f32)
    vecs[_V_B2, :OH2 * C2] = np.tile(np.asarray(p["b2"], f32), OH2)
    vecs[_V_G2, :C2] = np.asarray(p["g2"], f32)
    vecs[_V_BE2, :C2] = np.asarray(p["be2"], f32)
    vecs[_V_B3, :C3] = np.asarray(p["b3"], f32)
    vecs[_V_HB1, :128] = np.asarray(p["hb1"], f32)
    vecs[_V_HB2, :64] = np.asarray(p["hb2"], f32)
    vecs[_V_LNG, :64] = np.asarray(p["lng"], f32)
    vecs[_V_LNB, :64] = np.asarray(p["lnb"], f32)
    vecs[_V_HB3, :32] = np.asarray(p["hb3"], f32)
    vecs[_V_HB4, :4] = np.asarray(p["hb4"], f32)

    bf16 = jnp.bfloat16
    return {
        "w1b": jnp.asarray(w1b.reshape(K1 * KROW1, OH1 * C1), bf16),
        "w2b": jnp.asarray(w2b.reshape(K2 * KROW2, OH2 * C2), bf16),
        "w3b": jnp.asarray(w3b.reshape(K3 * KROW3, C3), bf16),
        "f1": jnp.asarray(f1),
        "f2": jnp.asarray(f2),
        "hw1": jnp.asarray(hw1p, bf16),
        "hw2": jnp.asarray(np.asarray(p["hw2"], f32), bf16),
        "hw3": jnp.asarray(np.asarray(p["hw3"], f32), bf16),
        "hw4": jnp.asarray(np.asarray(p["hw4"], f32), bf16),
        "vecs": jnp.asarray(vecs),
    }


# ---------------------------- parameter init ---------------------------------

def _xavier_uniform(key, fan_in, fan_out):
    bound = (6.0 / (fan_in + fan_out)) ** 0.5
    return jax.random.uniform(key, (fan_in, fan_out), jnp.float32, -bound, bound)


def _conv_init(key, cout, cin, kh, kw):
    fan_in = cin * kh * kw
    bound = 1.0 / (fan_in ** 0.5)
    kw_, kb_ = jax.random.split(key)
    w = jax.random.uniform(kw_, (cout, cin, kh, kw), jnp.float32, -bound, bound)
    b = jax.random.uniform(kb_, (cout,), jnp.float32, -bound, bound)
    return w, b


def init_params(key):
    ks = jax.random.split(key, 8)
    p = {}
    p["w1"], p["b1"] = _conv_init(ks[0], C1, C0, K1, K1)
    p["g1"], p["be1"] = jnp.ones((C1,), jnp.float32), jnp.zeros((C1,), jnp.float32)
    p["w2"], p["b2"] = _conv_init(ks[1], C2, C1, K2, K2)
    p["g2"], p["be2"] = jnp.ones((C2,), jnp.float32), jnp.zeros((C2,), jnp.float32)
    p["w3"], p["b3"] = _conv_init(ks[2], C3, C2, K3, K3)
    # head: xavier_uniform weights, bias filled with 0.01 (as in init_weights)
    p["hw1"] = _xavier_uniform(ks[3], 256, 128); p["hb1"] = jnp.full((128,), 0.01, jnp.float32)
    p["hw2"] = _xavier_uniform(ks[4], 128, 64);  p["hb2"] = jnp.full((64,), 0.01, jnp.float32)
    p["lng"] = jnp.ones((64,), jnp.float32);     p["lnb"] = jnp.zeros((64,), jnp.float32)
    p["hw3"] = _xavier_uniform(ks[5], 64, 32);   p["hb3"] = jnp.full((32,), 0.01, jnp.float32)
    p["hw4"] = _xavier_uniform(ks[6], 32, 4);    p["hb4"] = jnp.full((4,), 0.01, jnp.float32)
    return p


# ---------------------------- pure-JAX reference ------------------------------

def reference_forward(state, p):
    """f32 reference of the PyTorch module's forward (training-mode BN)."""
    n = state.shape[0]

    def conv_k1(x, w, b, stride):
        # Conv3d with kernel depth 1 == independent 2-D conv per depth slice.
        n_, cin, d, hh, ww = x.shape
        x2 = x.transpose(0, 2, 1, 3, 4).reshape(n_ * d, cin, hh, ww)
        y = lax.conv_general_dilated(
            x2, w, window_strides=(stride, stride), padding="VALID",
            dimension_numbers=("NCHW", "OIHW", "NCHW"),
            precision=lax.Precision.HIGHEST)
        cout, ho, wo = w.shape[0], y.shape[2], y.shape[3]
        y = y.reshape(n_, d, cout, ho, wo).transpose(0, 2, 1, 3, 4)
        return y + b[None, :, None, None, None]

    def bn3d(x, gamma, beta):
        mean = jnp.mean(x, axis=(0, 2, 3, 4), keepdims=True)
        var = jnp.mean(jnp.square(x - mean), axis=(0, 2, 3, 4), keepdims=True)
        xn = (x - mean) * lax.rsqrt(var + EPS_BN)
        return xn * gamma[None, :, None, None, None] + beta[None, :, None, None, None]

    dot = functools.partial(jnp.dot, precision=lax.Precision.HIGHEST)
    h = bn3d(jnp.maximum(conv_k1(state, p["w1"], p["b1"], S1), 0.0), p["g1"], p["be1"])
    h = bn3d(jnp.maximum(conv_k1(h, p["w2"], p["b2"], S2), 0.0), p["g2"], p["be2"])
    h = jnp.maximum(conv_k1(h, p["w3"], p["b3"], S3), 0.0)
    h = h.reshape(n, -1)                                   # torch Flatten: (c, d) order
    h = jnp.maximum(dot(h, p["hw1"]) + p["hb1"], 0.0)
    h = jnp.maximum(dot(h, p["hw2"]) + p["hb2"], 0.0)
    mu = jnp.mean(h, axis=-1, keepdims=True)
    var = jnp.mean(jnp.square(h - mu), axis=-1, keepdims=True)
    h = (h - mu) * lax.rsqrt(var + EPS_LN)
    h = h * p["lng"] + p["lnb"]
    h = jnp.maximum(dot(h, p["hw3"]) + p["hb3"], 0.0)
    return dot(h, p["hw4"]) + p["hb4"]


# --------------------------------- main ---------------------------------------

if __name__ == "__main__":
    N = 2  # batch of prepared states

    key = jax.random.PRNGKey(0)
    k_in, k_par = jax.random.split(key)
    # prepared state: (batch, channel=3, depth=4 patches, H=32, W=32)
    state = jax.random.normal(k_in, (N, C0, DEPTH, SUB, SUB), jnp.float32)
    params = init_params(k_par)
    packed = prepare_packed_params(params)   # one-time host-side repack

    fwd = jax.jit(policy_net_forward)
    out = jax.block_until_ready(fwd(state, packed))
    assert out.shape == (N, 4) and out.dtype == jnp.float32
    assert bool(jnp.all(jnp.isfinite(out)))

    # Tolerance check against the f32 reference (kernel matmul operands are bf16).
    ref = jax.block_until_ready(jax.jit(reference_forward)(state, params))
    np.testing.assert_allclose(np.asarray(out), np.asarray(ref), rtol=5e-2, atol=5e-2)

    print("KERNEL_OK")
</pallas_src>

<mosaic_0001>
module attributes {stable_mosaic.version = 11 : i64} {
  func.func @_fused_kernel(%arg0: memref<72x672xbf16, #tpu.memory_space<vmem>>, %arg1: memref<672x144xbf16, #tpu.memory_space<vmem>>, %arg2: memref<720x96xbf16, #tpu.memory_space<vmem>>, %arg3: memref<288x64xbf16, #tpu.memory_space<vmem>>, %arg4: memref<144x16xf32, #tpu.memory_space<vmem>>, %arg5: memref<96x32xf32, #tpu.memory_space<vmem>>, %arg6: memref<256x128xbf16, #tpu.memory_space<vmem>>, %arg7: memref<128x64xbf16, #tpu.memory_space<vmem>>, %arg8: memref<64x32xbf16, #tpu.memory_space<vmem>>, %arg9: memref<32x4xbf16, #tpu.memory_space<vmem>>, %arg10: memref<13x144xf32, #tpu.memory_space<vmem>>, %arg11: memref<2x4xf32, #tpu.memory_space<vmem>>) attributes {dimension_semantics = [], scalar_prefetch = 0 : i64, scratch_operands = 0 : i64, tpu.core_type = #tpu.core_type<tc>} {
    %c0 = arith.constant 0 : index
    %c0_0 = arith.constant 0 : index
    %0 = vector.load %arg0[%c0, %c0_0] : memref<72x672xbf16, #tpu.memory_space<vmem>>, vector<72x672xbf16>
    %c0_1 = arith.constant 0 : index
    %c0_2 = arith.constant 0 : index
    %1 = vector.load %arg1[%c0_1, %c0_2] : memref<672x144xbf16, #tpu.memory_space<vmem>>, vector<672x144xbf16>
    %cst = arith.constant dense<0.000000e+00> : vector<72x144xf32>
    %2 = tpu.matmul %0, %1, %cst {dimension_numbers = #tpu.dot_dimension_numbers<[1], [0], [0], [1], [0, 0, 1, 1], [], []>} : vector<72x672xbf16>, vector<672x144xbf16>, vector<72x144xf32> -> vector<72x144xf32>
    %c0_3 = arith.constant 0 : index
    %c0_4 = arith.constant 0 : index
    %3 = vector.load %arg10[%c0_3, %c0_4] : memref<13x144xf32, #tpu.memory_space<vmem>>, vector<1x144xf32>
    %4 = vector.broadcast %3 : vector<1x144xf32> to vector<72x144xf32>
    %5 = arith.addf %2, %4 : vector<72x144xf32>
    %cst_5 = arith.constant 0.000000e+00 : f32
    %6 = vector.broadcast %cst_5 : f32 to vector<72x144xf32>
    %7 = arith.maximumf %5, %6 : vector<72x144xf32>
    %c1 = arith.constant 1 : index
    %c0_6 = arith.constant 0 : index
    %8 = vector.load %arg10[%c1, %c0_6] : memref<13x144xf32, #tpu.memory_space<vmem>>, vector<1x16xf32>
    %c2 = arith.constant 2 : index
    %c0_7 = arith.constant 0 : index
    %9 = vector.load %arg10[%c2, %c0_7] : memref<13x144xf32, #tpu.memory_space<vmem>>, vector<1x16xf32>
    %cst_8 = arith.constant dense<0.000000e+00> : vector<144xf32>
    %10 = vector.multi_reduction <add>, %7, %cst_8 [0] : vector<72x144xf32> to vector<144xf32>
    %11 = vector.shape_cast %10 : vector<144xf32> to vector<1x144xf32>
    %12 = arith.mulf %7, %7 : vector<72x144xf32>
    %cst_9 = arith.constant dense<0.000000e+00> : vector<144xf32>
    %13 = vector.multi_reduction <add>, %12, %cst_9 [0] : vector<72x144xf32> to vector<144xf32>
    %14 = vector.shape_cast %13 : vector<144xf32> to vector<1x144xf32>
    %15 = tpu.concatenate %11, %14 in 0 : vector<1x144xf32>, vector<1x144xf32> -> vector<2x144xf32>
    %c0_10 = arith.constant 0 : index
    %c0_11 = arith.constant 0 : index
    %16 = vector.load %arg4[%c0_10, %c0_11] : memref<144x16xf32, #tpu.memory_space<vmem>>, vector<144x16xf32>
    %cst_12 = arith.constant dense<0.000000e+00> : vector<2x16xf32>
    %17 = tpu.matmul %15, %16, %cst_12 {dimension_numbers = #tpu.dot_dimension_numbers<[1], [0], [0], [1], [0, 0, 1, 1], [], []>} : vector<2x144xf32>, vector<144x16xf32>, vector<2x16xf32> -> vector<2x16xf32>
    %cst_13 = arith.constant 0.00154320989 : f32
    %18 = vector.broadcast %cst_13 : f32 to vector<2x16xf32>
    %19 = arith.mulf %17, %18 : vector<2x16xf32>
    %20 = vector.extract_strided_slice %19 {offsets = [0, 0], sizes = [1, 16], strides = [1, 1]} : vector<2x16xf32> to vector<1x16xf32>
    %21 = vector.extract_strided_slice %19 {offsets = [1, 0], sizes = [1, 16], strides = [1, 1]} : vector<2x16xf32> to vector<1x16xf32>
    %22 = arith.mulf %20, %20 : vector<1x16xf32>
    %23 = arith.subf %21, %22 : vector<1x16xf32>
    %cst_14 = arith.constant 9.99999974E-6 : f32
    %24 = vector.broadcast %cst_14 : f32 to vector<1x16xf32>
    %25 = arith.addf %23, %24 : vector<1x16xf32>
    %26 = math.rsqrt %25 : vector<1x16xf32>
    %27 = arith.mulf %8, %26 : vector<1x16xf32>
    %28 = arith.mulf %20, %27 : vector<1x16xf32>
    %29 = arith.subf %9, %28 : vector<1x16xf32>
    %30 = tpu.concatenate %27, %27, %27, %27, %27, %27, %27, %27, %27 in 1 : vector<1x16xf32>, vector<1x16xf32>, vector<1x16xf32>, vector<1x16xf32>, vector<1x16xf32>, vector<1x16xf32>, vector<1x16xf32>, vector<1x16xf32>, vector<1x16xf32> -> vector<1x144xf32>
    %31 = vector.broadcast %30 : vector<1x144xf32> to vector<72x144xf32>
    %32 = arith.mulf %7, %31 : vector<72x144xf32>
    %33 = tpu.concatenate %29, %29, %29, %29, %29, %29, %29, %29, %29 in 1 : vector<1x16xf32>, vector<1x16xf32>, vector<1x16xf32>, vector<1x16xf32>, vector<1x16xf32>, vector<1x16xf32>, vector<1x16xf32>, vector<1x16xf32>, vector<1x16xf32> -> vector<1x144xf32>
    %34 = vector.broadcast %33 : vector<1x144xf32> to vector<72x144xf32>
    %35 = arith.addf %32, %34 : vector<72x144xf32>
    %36 = vector.extract_strided_slice %35 {offsets = [0, 0], sizes = [8, 144], strides = [1, 1]} : vector<72x144xf32> to vector<8x144xf32>
    %37 = vector.extract_strided_slice %35 {offsets = [8, 0], sizes = [8, 144], strides = [1, 1]} : vector<72x144xf32> to vector<8x144xf32>
    %38 = vector.extract_strided_slice %35 {offsets = [16, 0], sizes = [8, 144], strides = [1, 1]} : vector<72x144xf32> to vector<8x144xf32>
    %39 = vector.extract_strided_slice %35 {offsets = [24, 0], sizes = [8, 144], strides = [1, 1]} : vector<72x144xf32> to vector<8x144xf32>
    %40 = vector.extract_strided_slice %35 {offsets = [32, 0], sizes = [8, 144], strides = [1, 1]} : vector<72x144xf32> to vector<8x144xf32>
    %41 = tpu.concatenate %36, %37, %38, %39, %40 in 1 : vector<8x144xf32>, vector<8x144xf32>, vector<8x144xf32>, vector<8x144xf32>, vector<8x144xf32> -> vector<8x720xf32>
    %42 = vector.extract_strided_slice %35 {offsets = [16, 0], sizes = [8, 144], strides = [1, 1]} : vector<72x144xf32> to vector<8x144xf32>
    %43 = vector.extract_strided_slice %35 {offsets = [24, 0], sizes = [8, 144], strides = [1, 1]} : vector<72x144xf32> to vector<8x144xf32>
    %44 = vector.extract_strided_slice %35 {offsets = [32, 0], sizes = [8, 144], strides = [1, 1]} : vector<72x144xf32> to vector<8x144xf32>
    %45 = vector.extract_strided_slice %35 {offsets = [40, 0], sizes = [8, 144], strides = [1, 1]} : vector<72x144xf32> to vector<8x144xf32>
    %46 = vector.extract_strided_slice %35 {offsets = [48, 0], sizes = [8, 144], strides = [1, 1]} : vector<72x144xf32> to vector<8x144xf32>
    %47 = tpu.concatenate %42, %43, %44, %45, %46 in 1 : vector<8x144xf32>, vector<8x144xf32>, vector<8x144xf32>, vector<8x144xf32>, vector<8x144xf32> -> vector<8x720xf32>
    %48 = vector.extract_strided_slice %35 {offsets = [32, 0], sizes = [8, 144], strides = [1, 1]} : vector<72x144xf32> to vector<8x144xf32>
    %49 = vector.extract_strided_slice %35 {offsets = [40, 0], sizes = [8, 144], strides = [1, 1]} : vector<72x144xf32> to vector<8x144xf32>
    %50 = vector.extract_strided_slice %35 {offsets = [48, 0], sizes = [8, 144], strides = [1, 1]} : vector<72x144xf32> to vector<8x144xf32>
    %51 = vector.extract_strided_slice %35 {offsets = [56, 0], sizes = [8, 144], strides = [1, 1]} : vector<72x144xf32> to vector<8x144xf32>
    %52 = vector.extract_strided_slice %35 {offsets = [64, 0], sizes = [8, 144], strides = [1, 1]} : vector<72x144xf32> to vector<8x144xf32>
    %53 = tpu.concatenate %48, %49, %50, %51, %52 in 1 : vector<8x144xf32>, vector<8x144xf32>, vector<8x144xf32>, vector<8x144xf32>, vector<8x144xf32> -> vector<8x720xf32>
    %54 = tpu.concatenate %41, %47, %53 in 0 : vector<8x720xf32>, vector<8x720xf32>, vector<8x720xf32> -> vector<24x720xf32>
    %55 = arith.truncf %54 : vector<24x720xf32> to vector<24x720xbf16>
    %c0_15 = arith.constant 0 : index
    %c0_16 = arith.constant 0 : index
    %56 = vector.load %arg2[%c0_15, %c0_16] : memref<720x96xbf16, #tpu.memory_space<vmem>>, vector<720x96xbf16>
    %cst_17 = arith.constant dense<0.000000e+00> : vector<24x96xf32>
    %57 = tpu.matmul %55, %56, %cst_17 {dimension_numbers = #tpu.dot_dimension_numbers<[1], [0], [0], [1], [0, 0, 1, 1], [], []>} : vector<24x720xbf16>, vector<720x96xbf16>, vector<24x96xf32> -> vector<24x96xf32>
    %c3 = arith.constant 3 : index
    %c0_18 = arith.constant 0 : index
    %58 = vector.load %arg10[%c3, %c0_18] : memref<13x144xf32, #tpu.memory_space<vmem>>, vector<1x96xf32>
    %59 = vector.broadcast %58 : vector<1x96xf32> to vector<24x96xf32>
    %60 = arith.addf %57, %59 : vector<24x96xf32>
    %cst_19 = arith.constant 0.000000e+00 : f32
    %61 = vector.broadcast %cst_19 : f32 to vector<24x96xf32>
    %62 = arith.maximumf %60, %61 : vector<24x96xf32>
    %c4 = arith.constant 4 : index
    %c0_20 = arith.constant 0 : index
    %63 = vector.load %arg10[%c4, %c0_20] : memref<13x144xf32, #tpu.memory_space<vmem>>, vector<1x32xf32>
    %c5 = arith.constant 5 : index
    %c0_21 = arith.constant 0 : index
    %64 = vector.load %arg10[%c5, %c0_21] : memref<13x144xf32, #tpu.memory_space<vmem>>, vector<1x32xf32>
    %cst_22 = arith.constant dense<0.000000e+00> : vector<96xf32>
    %65 = vector.multi_reduction <add>, %62, %cst_22 [0] : vector<24x96xf32> to vector<96xf32>
    %66 = vector.shape_cast %65 : vector<96xf32> to vector<1x96xf32>
    %67 = arith.mulf %62, %62 : vector<24x96xf32>
    %cst_23 = arith.constant dense<0.000000e+00> : vector<96xf32>
    %68 = vector.multi_reduction <add>, %67, %cst_23 [0] : vector<24x96xf32> to vector<96xf32>
    %69 = vector.shape_cast %68 : vector<96xf32> to vector<1x96xf32>
    %70 = tpu.concatenate %66, %69 in 0 : vector<1x96xf32>, vector<1x96xf32> -> vector<2x96xf32>
    %c0_24 = arith.constant 0 : index
    %c0_25 = arith.constant 0 : index
    %71 = vector.load %arg5[%c0_24, %c0_25] : memref<96x32xf32, #tpu.memory_space<vmem>>, vector<96x32xf32>
    %cst_26 = arith.constant dense<0.000000e+00> : vector<2x32xf32>
    %72 = tpu.matmul %70, %71, %cst_26 {dimension_numbers = #tpu.dot_dimension_numbers<[1], [0], [0], [1], [0, 0, 1, 1], [], []>} : vector<2x96xf32>, vector<96x32xf32>, vector<2x32xf32> -> vector<2x32xf32>
    %cst_27 = arith.constant 0.013888889 : f32
    %73 = vector.broadcast %cst_27 : f32 to vector<2x32xf32>
    %74 = arith.mulf %72, %73 : vector<2x32xf32>
    %75 = vector.extract_strided_slice %74 {offsets = [0, 0], sizes = [1, 32], strides = [1, 1]} : vector<2x32xf32> to vector<1x32xf32>
    %76 = vector.extract_strided_slice %74 {offsets = [1, 0], sizes = [1, 32], strides = [1, 1]} : vector<2x32xf32> to vector<1x32xf32>
    %77 = arith.mulf %75, %75 : vector<1x32xf32>
    %78 = arith.subf %76, %77 : vector<1x32xf32>
    %cst_28 = arith.constant 9.99999974E-6 : f32
    %79 = vector.broadcast %cst_28 : f32 to vector<1x32xf32>
    %80 = arith.addf %78, %79 : vector<1x32xf32>
    %81 = math.rsqrt %80 : vector<1x32xf32>
    %82 = arith.mulf %63, %81 : vector<1x32xf32>
    %83 = arith.mulf %75, %82 : vector<1x32xf32>
    %84 = arith.subf %64, %83 : vector<1x32xf32>
    %85 = tpu.concatenate %82, %82, %82 in 1 : vector<1x32xf32>, vector<1x32xf32>, vector<1x32xf32> -> vector<1x96xf32>
    %86 = vector.broadcast %85 : vector<1x96xf32> to vector<24x96xf32>
    %87 = arith.mulf %62, %86 : vector<24x96xf32>
    %88 = tpu.concatenate %84, %84, %84 in 1 : vector<1x32xf32>, vector<1x32xf32>, vector<1x32xf32> -> vector<1x96xf32>
    %89 = vector.broadcast %88 : vector<1x96xf32> to vector<24x96xf32>
    %90 = arith.addf %87, %89 : vector<24x96xf32>
    %91 = vector.extract_strided_slice %90 {offsets = [0, 0], sizes = [8, 96], strides = [1, 1]} : vector<24x96xf32> to vector<8x96xf32>
    %92 = vector.extract_strided_slice %90 {offsets = [8, 0], sizes = [8, 96], strides = [1, 1]} : vector<24x96xf32> to vector<8x96xf32>
    %93 = vector.extract_strided_slice %90 {offsets = [16, 0], sizes = [8, 96], strides = [1, 1]} : vector<24x96xf32> to vector<8x96xf32>
    %94 = tpu.concatenate %91, %92, %93 in 1 : vector<8x96xf32>, vector<8x96xf32>, vector<8x96xf32> -> vector<8x288xf32>
    %95 = arith.truncf %94 : vector<8x288xf32> to vector<8x288xbf16>
    %c0_29 = arith.constant 0 : index
    %c0_30 = arith.constant 0 : index
    %96 = vector.load %arg3[%c0_29, %c0_30] : memref<288x64xbf16, #tpu.memory_space<vmem>>, vector<288x64xbf16>
    %cst_31 = arith.constant dense<0.000000e+00> : vector<8x64xf32>
    %97 = tpu.matmul %95, %96, %cst_31 {dimension_numbers = #tpu.dot_dimension_numbers<[1], [0], [0], [1], [0, 0, 1, 1], [], []>} : vector<8x288xbf16>, vector<288x64xbf16>, vector<8x64xf32> -> vector<8x64xf32>
    %c6 = arith.constant 6 : index
    %c0_32 = arith.constant 0 : index
    %98 = vector.load %arg10[%c6, %c0_32] : memref<13x144xf32, #tpu.memory_space<vmem>>, vector<1x64xf32>
    %99 = vector.broadcast %98 : vector<1x64xf32> to vector<8x64xf32>
    %100 = arith.addf %97, %99 : vector<8x64xf32>
    %cst_33 = arith.constant 0.000000e+00 : f32
    %101 = vector.broadcast %cst_33 : f32 to vector<8x64xf32>
    %102 = arith.maximumf %100, %101 : vector<8x64xf32>
    %103 = vector.extract_strided_slice %102 {offsets = [0, 0], sizes = [2, 64], strides = [1, 1]} : vector<8x64xf32> to vector<2x64xf32>
    %104 = vector.extract_strided_slice %102 {offsets = [2, 0], sizes = [2, 64], strides = [1, 1]} : vector<8x64xf32> to vector<2x64xf32>
    %105 = vector.extract_strided_slice %102 {offsets = [4, 0], sizes = [2, 64], strides = [1, 1]} : vector<8x64xf32> to vector<2x64xf32>
    %106 = vector.extract_strided_slice %102 {offsets = [6, 0], sizes = [2, 64], strides = [1, 1]} : vector<8x64xf32> to vector<2x64xf32>
    %107 = tpu.concatenate %103, %104, %105, %106 in 1 : vector<2x64xf32>, vector<2x64xf32>, vector<2x64xf32>, vector<2x64xf32> -> vector<2x256xf32>
    %108 = arith.truncf %107 : vector<2x256xf32> to vector<2x256xbf16>
    %c0_34 = arith.constant 0 : index
    %c0_35 = arith.constant 0 : index
    %109 = vector.load %arg6[%c0_34, %c0_35] : memref<256x128xbf16, #tpu.memory_space<vmem>>, vector<256x128xbf16>
    %cst_36 = arith.constant dense<0.000000e+00> : vector<2x128xf32>
    %110 = tpu.matmul %108, %109, %cst_36 {dimension_numbers = #tpu.dot_dimension_numbers<[1], [0], [0], [1], [0, 0, 1, 1], [], []>} : vector<2x256xbf16>, vector<256x128xbf16>, vector<2x128xf32> -> vector<2x128xf32>
    %c7 = arith.constant 7 : index
    %c0_37 = arith.constant 0 : index
    %111 = vector.load %arg10[%c7, %c0_37] : memref<13x144xf32, #tpu.memory_space<vmem>>, vector<1x128xf32>
    %112 = vector.broadcast %111 : vector<1x128xf32> to vector<2x128xf32>
    %113 = arith.addf %110, %112 : vector<2x128xf32>
    %cst_38 = arith.constant 0.000000e+00 : f32
    %114 = vector.broadcast %cst_38 : f32 to vector<2x128xf32>
    %115 = arith.maximumf %113, %114 : vector<2x128xf32>
    %116 = arith.truncf %115 : vector<2x128xf32> to vector<2x128xbf16>
    %c0_39 = arith.constant 0 : index
    %c0_40 = arith.constant 0 : index
    %117 = vector.load %arg7[%c0_39, %c0_40] : memref<128x64xbf16, #tpu.memory_space<vmem>>, vector<128x64xbf16>
    %cst_41 = arith.constant dense<0.000000e+00> : vector<2x64xf32>
    %118 = tpu.matmul %116, %117, %cst_41 {dimension_numbers = #tpu.dot_dimension_numbers<[1], [0], [0], [1], [0, 0, 1, 1], [], []>} : vector<2x128xbf16>, vector<128x64xbf16>, vector<2x64xf32> -> vector<2x64xf32>
    %c8 = arith.constant 8 : index
    %c0_42 = arith.constant 0 : index
    %119 = vector.load %arg10[%c8, %c0_42] : memref<13x144xf32, #tpu.memory_space<vmem>>, vector<1x64xf32>
    %120 = vector.broadcast %119 : vector<1x64xf32> to vector<2x64xf32>
    %121 = arith.addf %118, %120 : vector<2x64xf32>
    %cst_43 = arith.constant 0.000000e+00 : f32
    %122 = vector.broadcast %cst_43 : f32 to vector<2x64xf32>
    %123 = arith.maximumf %121, %122 : vector<2x64xf32>
    %cst_44 = arith.constant dense<0.000000e+00> : vector<2xf32>
    %124 = vector.multi_reduction <add>, %123, %cst_44 [1] : vector<2x64xf32> to vector<2xf32>
    %125 = vector.shape_cast %124 : vector<2xf32> to vector<2x1xf32>
    %cst_45 = arith.constant 6.400000e+01 : f32
    %126 = vector.broadcast %cst_45 : f32 to vector<2x1xf32>
    %127 = arith.divf %125, %126 : vector<2x1xf32>
    %128 = vector.broadcast %127 : vector<2x1xf32> to vector<2x64xf32>
    %129 = arith.subf %123, %128 : vector<2x64xf32>
    %130 = arith.mulf %129, %129 : vector<2x64xf32>
    %cst_46 = arith.constant dense<0.000000e+00> : vector<2xf32>
    %131 = vector.multi_reduction <add>, %130, %cst_46 [1] : vector<2x64xf32> to vector<2xf32>
    %132 = vector.shape_cast %131 : vector<2xf32> to vector<2x1xf32>
    %cst_47 = arith.constant 6.400000e+01 : f32
    %133 = vector.broadcast %cst_47 : f32 to vector<2x1xf32>
    %134 = arith.divf %132, %133 : vector<2x1xf32>
    %135 = vector.broadcast %127 : vector<2x1xf32> to vector<2x64xf32>
    %136 = arith.subf %123, %135 : vector<2x64xf32>
    %cst_48 = arith.constant 9.99999974E-6 : f32
    %137 = vector.broadcast %cst_48 : f32 to vector<2x1xf32>
    %138 = arith.addf %134, %137 : vector<2x1xf32>
    %139 = math.rsqrt %138 : vector<2x1xf32>
    %140 = vector.broadcast %139 : vector<2x1xf32> to vector<2x64xf32>
    %141 = arith.mulf %136, %140 : vector<2x64xf32>
    %c9 = arith.constant 9 : index
    %c0_49 = arith.constant 0 : index
    %142 = vector.load %arg10[%c9, %c0_49] : memref<13x144xf32, #tpu.memory_space<vmem>>, vector<1x64xf32>
    %143 = vector.broadcast %142 : vector<1x64xf32> to vector<2x64xf32>
    %144 = arith.mulf %141, %143 : vector<2x64xf32>
    %c10 = arith.constant 10 : index
    %c0_50 = arith.constant 0 : index
    %145 = vector.load %arg10[%c10, %c0_50] : memref<13x144xf32, #tpu.memory_space<vmem>>, vector<1x64xf32>
    %146 = vector.broadcast %145 : vector<1x64xf32> to vector<2x64xf32>
    %147 = arith.addf %144, %146 : vector<2x64xf32>
    %148 = arith.truncf %147 : vector<2x64xf32> to vector<2x64xbf16>
    %c0_51 = arith.constant 0 : index
    %c0_52 = arith.constant 0 : index
    %149 = vector.load %arg8[%c0_51, %c0_52] : memref<64x32xbf16, #tpu.memory_space<vmem>>, vector<64x32xbf16>
    %cst_53 = arith.constant dense<0.000000e+00> : vector<2x32xf32>
    %150 = tpu.matmul %148, %149, %cst_53 {dimension_numbers = #tpu.dot_dimension_numbers<[1], [0], [0], [1], [0, 0, 1, 1], [], []>} : vector<2x64xbf16>, vector<64x32xbf16>, vector<2x32xf32> -> vector<2x32xf32>
    %c11 = arith.constant 11 : index
    %c0_54 = arith.constant 0 : index
    %151 = vector.load %arg10[%c11, %c0_54] : memref<13x144xf32, #tpu.memory_space<vmem>>, vector<1x32xf32>
    %152 = vector.broadcast %151 : vector<1x32xf32> to vector<2x32xf32>
    %153 = arith.addf %150, %152 : vector<2x32xf32>
    %cst_55 = arith.constant 0.000000e+00 : f32
    %154 = vector.broadcast %cst_55 : f32 to vector<2x32xf32>
    %155 = arith.maximumf %153, %154 : vector<2x32xf32>
    %156 = arith.truncf %155 : vector<2x32xf32> to vector<2x32xbf16>
    %c0_56 = arith.constant 0 : index
    %c0_57 = arith.constant 0 : index
    %157 = vector.load %arg9[%c0_56, %c0_57] : memref<32x4xbf16, #tpu.memory_space<vmem>>, vector<32x4xbf16>
    %cst_58 = arith.constant dense<0.000000e+00> : vector<2x4xf32>
    %158 = tpu.matmul %156, %157, %cst_58 {dimension_numbers = #tpu.dot_dimension_numbers<[1], [0], [0], [1], [0, 0, 1, 1], [], []>} : vector<2x32xbf16>, vector<32x4xbf16>, vector<2x4xf32> -> vector<2x4xf32>
    %c12 = arith.constant 12 : index
    %c0_59 = arith.constant 0 : index
    %159 = vector.load %arg10[%c12, %c0_59] : memref<13x144xf32, #tpu.memory_space<vmem>>, vector<1x4xf32>
    %160 = vector.broadcast %159 : vector<1x4xf32> to vector<2x4xf32>
    %161 = arith.addf %158, %160 : vector<2x4xf32>
    %c0_60 = arith.constant 0 : index
    %c0_61 = arith.constant 0 : index
    %162 = vector.load %arg11[%c0_60, %c0_61] : memref<2x4xf32, #tpu.memory_space<vmem>>, vector<2x4xf32>
    tpu.vector_store %arg11[%c0_60, %c0_61], %161 {strides = array<i32>} : memref<2x4xf32, #tpu.memory_space<vmem>>, vector<2x4xf32>,
    return
  }
}

</mosaic_0001>

<bundles_post_ra>
// kernel: policy_net_forward.1
= control target key start
LH: loop header
LB: loop body
LE: loop exit
PB: predicated region body
PF: predicated region fallthrough
CT: control target
= control target key end

     0   :  { %s5514_s0 = inlined_call_operand.vmem [shape: bf16[72,672], index: 0, kind: input, shape index: {}]   ;;  %s5515_s1 = inlined_call_operand.vmem [shape: bf16[672,144], index: 1, kind: input, shape index: {}]   ;;  %s5516_s2 = inlined_call_operand.vmem [shape: bf16[720,96], index: 2, kind: input, shape index: {}]   ;;  %s5517_s3 = inlined_call_operand.vmem [shape: bf16[288,64], index: 3, kind: input, shape index: {}]   ;;  %s5518_s4 = inlined_call_operand.vmem [shape: f32[144,16], index: 4, kind: input, shape index: {}]   ;;  %s5519_s5 = inlined_call_operand.vmem [shape: f32[96,32], index: 5, kind: input, shape index: {}]   ;;  %s5520_s6 = inlined_call_operand.vmem [shape: bf16[256,128], index: 6, kind: input, shape index: {}]   ;;  %s5521_s7 = inlined_call_operand.vmem [shape: bf16[128,64], index: 7, kind: input, shape index: {}]   ;;  %s5522_s8 = inlined_call_operand.vmem [shape: bf16[64,32], index: 8, kind: input, shape index: {}]   ;;  %s5523_s9 = inlined_call_operand.vmem [shape: bf16[32,4], index: 9, kind: input, shape index: {}]   ;;  %s5524_s10 = inlined_call_operand.vmem [shape: f32[13,144], index: 10, kind: input, shape index: {}]   ;;  %s5525_s11 = inlined_call_operand.hbm [shape: f32[2,4], index: 11, kind: output, shape index: {}]  }
   0x1   :  { %v2883_v0 = vld [vmem:[%s5515_s1 + $0x70] sm:$0xf]  ;;  %v3589_v1 = vld [vmem:[%s5515_s1 + $0x74] sm:$0xf0]  ;;  %v2875_v11 = vld [vmem:[%s5515_s1 + $0x60] sm:$0xf] }
   0x2   :  { %v2947_v2 = vld [vmem:[%s5515_s1 + $0xf0] sm:$0xf]  ;;  %v2884_v3 = vor.u32 %v3589_v1, %v2883_v0  ;;  %v3605_v4 = vld [vmem:[%s5515_s1 + $0xf4] sm:$0xf0]  ;;  %v3587_v13 = vld [vmem:[%s5515_s1 + $0x64] sm:$0xf0] }
   0x3   :  { %v3011_v5 = vld [vmem:[%s5515_s1 + $0x170] sm:$0xf]  ;;  %v3621_v6 = vld [vmem:[%s5515_s1 + $0x174] sm:$0xf0]  ;;  %v2948_v7 = vor.u32 %v3605_v4, %v2947_v2  ;;  %v2939_v14 = vld [vmem:[%s5515_s1 + $0xe0] sm:$0xf]  ;;  %v2876_v16 = vor.u32 %v3587_v13, %v2875_v11 }
   0x4   :  { %v3012_v8 = vor.u32 %v3621_v6, %v3011_v5  ;;  %v3075_v9 = vld [vmem:[%s5515_s1 + $0x1f0] sm:$0xf]  ;;  %v3637_v10 = vld [vmem:[%s5515_s1 + $0x1f4] sm:$0xf0]  ;;  %729 = vmatpush.bf16.msra.mxu0 %v2884_v3  ;;  %v3603_v15 = vld [vmem:[%s5515_s1 + $0xe4] sm:$0xf0] }
   0x5   :  { %v3076_v12 = vor.u32 %v3637_v10, %v3075_v9  ;;  %762 = vmatpush.bf16.msra.mxu1 %v2948_v7  ;;  %v2940_v17 = vor.u32 %v3603_v15, %v2939_v14  ;;  %v3003_v18 = vld [vmem:[%s5515_s1 + $0x160] sm:$0xf]  ;;  %v3619_v19 = vld [vmem:[%s5515_s1 + $0x164] sm:$0xf0]  ;;  %v2867_v23 = vld [vmem:[%s5515_s1 + $0x50] sm:$0xf] }
   0x6   :  { %795 = vmatpush.bf16.msra.mxu2 %v3012_v8  ;;  %v3067_v20 = vld [vmem:[%s5515_s1 + $0x1e0] sm:$0xf]  ;;  %v3004_v21 = vor.u32 %v3619_v19, %v3003_v18  ;;  %v3635_v22 = vld [vmem:[%s5515_s1 + $0x1e4] sm:$0xf0]  ;;  %v3585_v24 = vld [vmem:[%s5515_s1 + $0x54] sm:$0xf0] }
   0x7   :  { %828 = vmatpush.bf16.msra.mxu3 %v3076_v12  ;;  %v3068_v25 = vor.u32 %v3635_v22, %v3067_v20  ;;  %v2931_v26 = vld [vmem:[%s5515_s1 + $0xd0] sm:$0xf]  ;;  %v3601_v27 = vld [vmem:[%s5515_s1 + $0xd4] sm:$0xf0]  ;;  %v2868_v29 = vor.u32 %v3585_v24, %v2867_v23  ;;  %v2859_v35 = vld [vmem:[%s5515_s1 + $0x40] sm:$0xf] }
   0x8   :  { %v2995_v28 = vld [vmem:[%s5515_s1 + $0x150] sm:$0xf]  ;;  %730 = vmatpush.bf16.msra.mxu0 %v2876_v16  ;;  %v3617_v30 = vld [vmem:[%s5515_s1 + $0x154] sm:$0xf0]  ;;  %v2932_v33 = vor.u32 %v3601_v27, %v2931_v26  ;;  %v3583_v36 = vld [vmem:[%s5515_s1 + $0x44] sm:$0xf0] }
   0x9   :  { %v3059_v31 = vld [vmem:[%s5515_s1 + $0x1d0] sm:$0xf]  ;;  %v3633_v32 = vld [vmem:[%s5515_s1 + $0x1d4] sm:$0xf0]  ;;  %763 = vmatpush.bf16.msra.mxu1 %v2940_v17  ;;  %v2996_v34 = vor.u32 %v3617_v30, %v2995_v28  ;;  %v2923_v37 = vld [vmem:[%s5515_s1 + $0xc0] sm:$0xf]  ;;  %v2860_v44 = vor.u32 %v3583_v36, %v2859_v35 }
   0xa   :  { %796 = vmatpush.bf16.msra.mxu2 %v3004_v21  ;;  %v3060_v38 = vor.u32 %v3633_v32, %v3059_v31  ;;  %v3599_v39 = vld [vmem:[%s5515_s1 + $0xc4] sm:$0xf0]  ;;  %v2987_v40 = vld [vmem:[%s5515_s1 + $0x140] sm:$0xf]  ;;  %v2851_v47 = vld [vmem:[%s5515_s1 + $0x30] sm:$0xf] }
   0xb   :  { %829 = vmatpush.bf16.msra.mxu3 %v3068_v25  ;;  %v3615_v41 = vld [vmem:[%s5515_s1 + $0x144] sm:$0xf0]  ;;  %v3051_v42 = vld [vmem:[%s5515_s1 + $0x1c0] sm:$0xf]  ;;  %v2924_v45 = vor.u32 %v3599_v39, %v2923_v37  ;;  %v3581_v48 = vld [vmem:[%s5515_s1 + $0x34] sm:$0xf0] }
   0xc   :  { %v3631_v43 = vld [vmem:[%s5515_s1 + $0x1c4] sm:$0xf0]  ;;  %731 = vmatpush.bf16.msra.mxu0 %v2868_v29  ;;  %v2988_v46 = vor.u32 %v3615_v41, %v2987_v40  ;;  %v2915_v49 = vld [vmem:[%s5515_s1 + $0xb0] sm:$0xf]  ;;  %v3597_v51 = vld [vmem:[%s5515_s1 + $0xb4] sm:$0xf0]  ;;  %v2852_v56 = vor.u32 %v3581_v48, %v2851_v47 }
   0xd   :  { %764 = vmatpush.bf16.msra.mxu1 %v2932_v33  ;;  %v3052_v50 = vor.u32 %v3631_v43, %v3051_v42  ;;  %v2979_v52 = vld [vmem:[%s5515_s1 + $0x130] sm:$0xf]  ;;  %v3613_v53 = vld [vmem:[%s5515_s1 + $0x134] sm:$0xf0]  ;;  %v2916_v57 = vor.u32 %v3597_v51, %v2915_v49  ;;  %v2843_v59 = vld [vmem:[%s5515_s1 + $0x20] sm:$0xf] }
   0xe   :  { %797 = vmatpush.bf16.msra.mxu2 %v2996_v34  ;;  %v3043_v54 = vld [vmem:[%s5515_s1 + $0x1b0] sm:$0xf]  ;;  %v3629_v55 = vld [vmem:[%s5515_s1 + $0x1b4] sm:$0xf0]  ;;  %v2980_v58 = vor.u32 %v3613_v53, %v2979_v52  ;;  %v3579_v60 = vld [vmem:[%s5515_s1 + $0x24] sm:$0xf0] }
   0xf   :  { %830 = vmatpush.bf16.msra.mxu3 %v3060_v38  ;;  %v2907_v61 = vld [vmem:[%s5515_s1 + $0xa0] sm:$0xf]  ;;  %v3044_v62 = vor.u32 %v3629_v55, %v3043_v54  ;;  %v3595_v63 = vld [vmem:[%s5515_s1 + $0xa4] sm:$0xf0]  ;;  %v2844_v4 = vor.u32 %v3579_v60, %v2843_v59  ;;  %v2835_v7 = vld [vmem:[%s5515_s1 + $0x10] sm:$0xf] }
  0x10   :  { %732 = vmatpush.bf16.msra.mxu0 %v2860_v44  ;;  %v2971_v0 = vld [vmem:[%s5515_s1 + $0x120] sm:$0xf]  ;;  %v3611_v1 = vld [vmem:[%s5515_s1 + $0x124] sm:$0xf0]  ;;  %v2908_v5 = vor.u32 %v3595_v63, %v2907_v61  ;;  %v3577_v8 = vld [vmem:[%s5515_s1 + $0x14] sm:$0xf0] }
  0x11   :  { %765 = vmatpush.bf16.msra.mxu1 %v2924_v45  ;;  %v3035_v2 = vld [vmem:[%s5515_s1 + $0x1a0] sm:$0xf]  ;;  %v3627_v3 = vld [vmem:[%s5515_s1 + $0x1a4] sm:$0xf0]  ;;  %v2972_v6 = vor.u32 %v3611_v1, %v2971_v0  ;;  %v2899_v9 = vld [vmem:[%s5515_s1 + $0x90] sm:$0xf]  ;;  %v2836_v17 = vor.u32 %v3577_v8, %v2835_v7 }
  0x12   :  { %798 = vmatpush.bf16.msra.mxu2 %v2988_v46  ;;  %v3036_v10 = vor.u32 %v3627_v3, %v3035_v2  ;;  %v3593_v11 = vld [vmem:[%s5515_s1 + $0x94] sm:$0xf0]  ;;  %v2963_v12 = vld [vmem:[%s5515_s1 + $0x110] sm:$0xf]  ;;  %v2827_v16 = vld [vmem:[%s5515_s1] sm:$0xf] }
  0x13   :  { %831 = vmatpush.bf16.msra.mxu3 %v3052_v50  ;;  %v3609_v13 = vld [vmem:[%s5515_s1 + $0x114] sm:$0xf0]  ;;  %v3027_v14 = vld [vmem:[%s5515_s1 + $0x190] sm:$0xf]  ;;  %v3575_v18 = vld [vmem:[%s5515_s1 + $0x4] sm:$0xf0]  ;;  %v2900_v21 = vor.u32 %v3593_v11, %v2899_v9 }
  0x14   :  { %733 = vmatpush.bf16.msra.mxu0 %v2852_v56  ;;  %v3625_v15 = vld [vmem:[%s5515_s1 + $0x194] sm:$0xf0]  ;;  %v2891_v19 = vld [vmem:[%s5515_s1 + $0x80] sm:$0xf]  ;;  %v3591_v20 = vld [vmem:[%s5515_s1 + $0x84] sm:$0xf0]  ;;  %v2964_v22 = vor.u32 %v3609_v13, %v2963_v12  ;;  %v2828_v34 = vor.u32 %v3575_v18, %v2827_v16 }
  0x15   :  { %766 = vmatpush.bf16.msra.mxu1 %v2916_v57  ;;  %v2955_v23 = vld [vmem:[%s5515_s1 + $0x100] sm:$0xf]  ;;  %v3607_v24 = vld [vmem:[%s5515_s1 + $0x104] sm:$0xf0]  ;;  %v3028_v26 = vor.u32 %v3625_v15, %v3027_v14  ;;  %v3553_v29 = vld [vmem:[%s5514_s0 + $0x14] sm:$0xf0]  ;;  %v2892_v38 = vor.u32 %v3591_v20, %v2891_v19 }
  0x16   :  { %799 = vmatpush.bf16.msra.mxu2 %v2980_v58  ;;  %v3019_v25 = vld [vmem:[%s5515_s1 + $0x180] sm:$0xf]  ;;  %v3623_v27 = vld [vmem:[%s5515_s1 + $0x184] sm:$0xf0]  ;;  %v3550_v30 = vld [vmem:[%s5514_s0 + $0x4] sm:$0xf]  ;;  %v2956_v39 = vor.u32 %v3607_v24, %v2955_v23 }
  0x17   :  { %832 = vmatpush.bf16.msra.mxu3 %v3044_v62  ;;  %v2731_v28 = vld [vmem:[%s5514_s0] sm:$0xf]  ;;  %v2733_v31 = vld [vmem:[%s5514_s0 + $0x18] sm:$0xf0]  ;;  %v3588_v32 = vld [vmem:[%s5515_s1 + $0x74] sm:$0xf]  ;;  %v3020_v43 = vor.u32 %v3623_v27, %v3019_v25 }
  0x18   :  { %734 = vmatpush.bf16.msra.mxu0 %v2844_v4  ;;  %v2885_v33 = vld [vmem:[%s5515_s1 + $0x78] sm:$0xf0]  ;;  %v2739_v35 = vld [vmem:[%s5514_s0 + $0x8] sm:$0xf]  ;;  %v3604_v36 = vld [vmem:[%s5515_s1 + $0xf4] sm:$0xf]  ;;  %v4160_v48 = vor.u32 %v3553_v29, %v2731_v28  ;;  %v4171_v53 = vor.u32 %v3550_v30, %v2733_v31 }
  0x19   :  { %767 = vmatpush.bf16.msra.mxu1 %v2908_v5  ;;  %v2949_v37 = vld [vmem:[%s5515_s1 + $0xf8] sm:$0xf0]  ;;  %v3554_v40 = vld [vmem:[%s5514_s0 + $0x1c] sm:$0xf0]  ;;  %v3551_v41 = vld [vmem:[%s5514_s0 + $0xc] sm:$0xf]  ;;  %v2888_v44 = vor.u32 %v3588_v32, %v2885_v33 }
  0x1a   :  { %800 = vmatpush.bf16.msra.mxu2 %v2972_v6  ;;  %v2741_v42 = vld [vmem:[%s5514_s0 + $0x20] sm:$0xf0]  ;;  %v3139_v45 = vld [vmem:[%s5515_s1 + $0x270] sm:$0xf]  ;;  %v3653_v46 = vld [vmem:[%s5515_s1 + $0x274] sm:$0xf0]  ;;  %v2952_v49 = vor.u32 %v3604_v36, %v2949_v37  ;;  %v4173_v54 = vor.u32 %v3554_v40, %v2739_v35 }
  0x1b   :  { %833 = vmatpush.bf16.msra.mxu3 %v3036_v10  ;;  %v3155_v47 = vld [vmem:[%s5515_s1 + $0x290] sm:$0xf]  ;;  %v3657_v50 = vld [vmem:[%s5515_s1 + $0x294] sm:$0xf0]  ;;  %v3586_v51 = vld [vmem:[%s5515_s1 + $0x64] sm:$0xf]  ;;  %v4181_v57 = vor.u32 %v3551_v41, %v2741_v42  ;;  %v3140_v58 = vor.u32 %v3653_v46, %v3139_v45 }
  0x1c   :  { %735 = vmatpush.bf16.msra.mxu0 %v2836_v17  ;;  %v2877_v52 = vld [vmem:[%s5515_s1 + $0x68] sm:$0xf0]  ;;  %v3602_v55 = vld [vmem:[%s5515_s1 + $0xe4] sm:$0xf]  ;;  %v3156_v59 = vor.u32 %v3657_v50, %v3155_v47  ;;  %v3131_v61 = vld [vmem:[%s5515_s1 + $0x260] sm:$0xf] }
  0x1d   :  { %768 = vmatpush.bf16.msra.mxu1 %v2900_v21  ;;  %v2941_v56 = vld [vmem:[%s5515_s1 + $0xe8] sm:$0xf0]  ;;  %v2880_v60 = vor.u32 %v3586_v51, %v2877_v52  ;;  %v3651_v62 = vld [vmem:[%s5515_s1 + $0x264] sm:$0xf0]  ;;  %v3584_v0 = vld [vmem:[%s5515_s1 + $0x54] sm:$0xf] }
  0x1e   :  { %801 = vmatpush.bf16.msra.mxu2 %v2964_v22  ;;  %v2944_v63 = vor.u32 %v3602_v55, %v2941_v56  ;;  %v2869_v1 = vld [vmem:[%s5515_s1 + $0x58] sm:$0xf0]  ;;  %v3600_v2 = vld [vmem:[%s5515_s1 + $0xd4] sm:$0xf]  ;;  %v3132_v4 = vor.u32 %v3651_v62, %v3131_v61  ;;  %v3123_v6 = vld [vmem:[%s5515_s1 + $0x250] sm:$0xf] }
  0x1f   :  { %834 = vmatpush.bf16.msra.mxu3 %v3028_v26  ;;  %v2933_v3 = vld [vmem:[%s5515_s1 + $0xd8] sm:$0xf0]  ;;  %v2872_v5 = vor.u32 %v3584_v0, %v2869_v1  ;;  %v3649_v7 = vld [vmem:[%s5515_s1 + $0x254] sm:$0xf0]  ;;  %v3582_v9 = vld [vmem:[%s5515_s1 + $0x44] sm:$0xf] }
  0x20   :  { %736 = vmatpush.bf16.msra.mxu0 %v2828_v34  ;;  %v2936_v8 = vor.u32 %v3600_v2, %v2933_v3  ;;  %v2861_v10 = vld [vmem:[%s5515_s1 + $0x48] sm:$0xf0]  ;;  %v3598_v11 = vld [vmem:[%s5515_s1 + $0xc4] sm:$0xf]  ;;  %v3124_v13 = vor.u32 %v3649_v7, %v3123_v6  ;;  %v3147_v14 = vld [vmem:[%s5515_s1 + $0x280] sm:$0xf] }
  0x21   :  { %769 = vmatpush.bf16.msra.mxu1 %v2892_v38  ;;  %v2925_v12 = vld [vmem:[%s5515_s1 + $0xc8] sm:$0xf0]  ;;  %v3655_v15 = vld [vmem:[%s5515_s1 + $0x284] sm:$0xf0]  ;;  %v2755_v16 = vld [vmem:[%s5514_s0 + $0x30] sm:$0xf]  ;;  %v2864_v18 = vor.u32 %v3582_v9, %v2861_v10 }
  0x22   :  { %802 = vmatpush.bf16.msra.mxu2 %v2956_v39  ;;  %v3559_v17 = vld [vmem:[%s5514_s0 + $0x44] sm:$0xf0]  ;;  %v3115_v19 = vld [vmem:[%s5515_s1 + $0x240] sm:$0xf]  ;;  %v3148_v21 = vor.u32 %v3655_v15, %v3147_v14 }
  0x23   :  { %835 = vmatpush.bf16.msra.mxu3 %v3020_v43  ;;  %737 = vmatmul.bf16.vlgmr.msra.gmra.mxu0 %v4160_v48  ;;  %v3647_v20 = vld [vmem:[%s5515_s1 + $0x244] sm:$0xf0] }
  0x24   :  { %770 = vmatmul.bf16.vlgmr.msra.gmra.mxu1 %v4171_v53  ;;  %861 = vmatpush.bf16.msrb.mxu0 %v3140_v58 }
  0x25   :  { %803 = vmatmul.bf16.vlgmr.msra.gmra.mxu2 %v4173_v54  ;;  %900 = vmatpush.bf16.msrb.mxu1 %v3156_v59 }
  0x26   :  { %927 = vmatpush.bf16.msrb.mxu2 %v2888_v44  ;;  %836 = vmatmul.bf16.vlgmr.msra.gmra.mxu3 %v4181_v57 }
  0x27   :  { %960 = vmatpush.bf16.msrb.mxu3 %v2952_v49 }
  0x28   :  { %862 = vmatpush.bf16.msrb.mxu0 %v3132_v4 }
  0x2a   :  { %928 = vmatpush.bf16.msrb.mxu2 %v2880_v60 }
  0x2b   :  { %961 = vmatpush.bf16.msrb.mxu3 %v2944_v63 }
  0x2e   :  { %929 = vmatpush.bf16.msrb.mxu2 %v2872_v5 }
  0x2f   :  { %16 = vsyncpa [#allocation3], 0  ;;  %v3556_v22 = vld [vmem:[%s5514_s0 + $0x34] sm:$0xf]  ;;  %962 = vmatpush.bf16.msrb.mxu3 %v2936_v8  ;;  %v2928_v23 = vor.u32 %v3598_v11, %v2925_v12  ;;  %v2853_v25 = vld [vmem:[%s5515_s1 + $0x38] sm:$0xf0]  ;;  %901 = vmatpush.bf16.msrb.mxu1 %v3148_v21  ;;  %v3116_v32 = vor.u32 %v3647_v20, %v3115_v19  ;;  %v4277_v37 = vor.u32 %v3559_v17, %v2755_v16 }
  0x30   :  { %v3580_v24 = vld [vmem:[%s5515_s1 + $0x34] sm:$0xf]  ;;  %v2757_v26 = vld [vmem:[%s5514_s0 + $0x48] sm:$0xf0]  ;;  %v2917_v28 = vld [vmem:[%s5515_s1 + $0xb8] sm:$0xf0]  ;;  %863 = vmatpush.bf16.msrb.mxu0 %v3124_v13 }
  0x31   :  { %v3596_v27 = vld [vmem:[%s5515_s1 + $0xb4] sm:$0xf]  ;;  %v2763_v29 = vld [vmem:[%s5514_s0 + $0x38] sm:$0xf]  ;;  %v3560_v30 = vld [vmem:[%s5514_s0 + $0x4c] sm:$0xf0]  ;;  %v2856_v34 = vor.u32 %v3580_v24, %v2853_v25  ;;  %v4279_v39 = vor.u32 %v3556_v22, %v2757_v26 }
  0x32   :  { %v3557_v31 = vld [vmem:[%s5514_s0 + $0x3c] sm:$0xf]  ;;  %v2765_v33 = vld [vmem:[%s5514_s0 + $0x50] sm:$0xf0]  ;;  %930 = vmatpush.bf16.msrb.mxu2 %v2864_v18  ;;  %v3107_v35 = vld [vmem:[%s5515_s1 + $0x230] sm:$0xf]  ;;  %v2920_v38 = vor.u32 %v3596_v27, %v2917_v28  ;;  %v4281_v40 = vor.u32 %v3560_v30, %v2763_v29 }
  0x33   :  { %v3645_v36 = vld [vmem:[%s5515_s1 + $0x234] sm:$0xf0]  ;;  %963 = vmatpush.bf16.msrb.mxu3 %v2928_v23  ;;  %v4283_v41 = vor.u32 %v3557_v31, %v2765_v33  ;;  %742 = vmatmul.bf16.gmra.mxu0 %v4277_v37  ;;  %v3578_v43 = vld [vmem:[%s5515_s1 + $0x24] sm:$0xf]  ;;  %v2845_v44 = vld [vmem:[%s5515_s1 + $0x28] sm:$0xf0] }
  0x34   :  { %864 = vmatpush.bf16.msrb.mxu0 %v3116_v32  ;;  %v3108_v42 = vor.u32 %v3645_v36, %v3107_v35  ;;  %775 = vmatmul.bf16.gmra.mxu1 %v4279_v39  ;;  %v3099_v45 = vld [vmem:[%s5515_s1 + $0x220] sm:$0xf]  ;;  %v2848_v46 = vor.u32 %v3578_v43, %v2845_v44  ;;  %v3643_v47 = vld [vmem:[%s5515_s1 + $0x224] sm:$0xf0]  ;;  %v3594_v49 = vld [vmem:[%s5515_s1 + $0xa4] sm:$0xf] }
  0x35   :  { %808 = vmatmul.bf16.gmra.mxu2 %v4281_v40  ;;  %v2909_v50 = vld [vmem:[%s5515_s1 + $0xa8] sm:$0xf0]  ;;  %v3100_v51 = vor.u32 %v3643_v47, %v3099_v45  ;;  %v3576_v55 = vld [vmem:[%s5515_s1 + $0x14] sm:$0xf]  ;;  %v2837_v56 = vld [vmem:[%s5515_s1 + $0x18] sm:$0xf0] }
  0x36   :  { %931 = vmatpush.bf16.msrb.mxu2 %v2856_v34  ;;  %841 = vmatmul.bf16.gmra.mxu3 %v4283_v41  ;;  %v2912_v52 = vor.u32 %v3594_v49, %v2909_v50  ;;  %v3091_v58 = vld [vmem:[%s5515_s1 + $0x210] sm:$0xf]  ;;  %v2840_v59 = vor.u32 %v3576_v55, %v2837_v56  ;;  %v3641_v60 = vld [vmem:[%s5515_s1 + $0x214] sm:$0xf0]  ;;  %v3592_v61 = vld [vmem:[%s5515_s1 + $0x94] sm:$0xf] }
  0x37   :  { %964 = vmatpush.bf16.msrb.mxu3 %v2920_v38  ;;  %v2901_v62 = vld [vmem:[%s5515_s1 + $0x98] sm:$0xf0]  ;;  %v3092_v63 = vor.u32 %v3641_v60, %v3091_v58  ;;  %v2779_v1 = vld [vmem:[%s5514_s0 + $0x60] sm:$0xf]  ;;  %v3565_v2 = vld [vmem:[%s5514_s0 + $0x74] sm:$0xf0] }
  0x38   :  { %865 = vmatpush.bf16.msrb.mxu0 %v3108_v42  ;;  %v2904_v0 = vor.u32 %v3592_v61, %v2901_v62  ;;  %v3562_v3 = vld [vmem:[%s5514_s0 + $0x64] sm:$0xf]  ;;  %v2781_v4 = vld [vmem:[%s5514_s0 + $0x78] sm:$0xf0]  ;;  %v2787_v5 = vld [vmem:[%s5514_s0 + $0x68] sm:$0xf]  ;;  %v4349_v9 = vor.u32 %v3565_v2, %v2779_v1 }
  0x39   :  { %v3566_v6 = vld [vmem:[%s5514_s0 + $0x7c] sm:$0xf0]  ;;  %v3563_v7 = vld [vmem:[%s5514_s0 + $0x6c] sm:$0xf]  ;;  %v2789_v8 = vld [vmem:[%s5514_s0 + $0x80] sm:$0xf0]  ;;  %v4351_v10 = vor.u32 %v3562_v3, %v2781_v4 }
  0x3a   :  { %932 = vmatpush.bf16.msrb.mxu2 %v2848_v46  ;;  %v4353_v11 = vor.u32 %v3566_v6, %v2787_v5  ;;  %v4355_v12 = vor.u32 %v3563_v7, %v2789_v8  ;;  %v3574_v13 = vld [vmem:[%s5515_s1 + $0x4] sm:$0xf]  ;;  %v2829_v14 = vld [vmem:[%s5515_s1 + $0x8] sm:$0xf0]  ;;  %v3083_v15 = vld [vmem:[%s5515_s1 + $0x200] sm:$0xf] }
  0x3b   :  { %965 = vmatpush.bf16.msrb.mxu3 %v2912_v52  ;;  %v2832_v16 = vor.u32 %v3574_v13, %v2829_v14  ;;  %v3639_v17 = vld [vmem:[%s5515_s1 + $0x204] sm:$0xf0]  ;;  %v3590_v18 = vld [vmem:[%s5515_s1 + $0x84] sm:$0xf]  ;;  %v2893_v19 = vld [vmem:[%s5515_s1 + $0x88] sm:$0xf0] }
  0x3c   :  { %866 = vmatpush.bf16.msrb.mxu0 %v3100_v51  ;;  %v3084_v20 = vor.u32 %v3639_v17, %v3083_v15  ;;  %v2896_v21 = vor.u32 %v3590_v18, %v2893_v19  ;;  %v2803_v22 = vld [vmem:[%s5514_s0 + $0x90] sm:$0xf]  ;;  %v3571_v23 = vld [vmem:[%s5514_s0 + $0xa4] sm:$0xf0]  ;;  %v3568_v24 = vld [vmem:[%s5514_s0 + $0x94] sm:$0xf] }
  0x3d   :  { %v2805_v25 = vld [vmem:[%s5514_s0 + $0xa8] sm:$0xf0]  ;;  %v2811_v26 = vld [vmem:[%s5514_s0 + $0x98] sm:$0xf]  ;;  %v3572_v27 = vld [vmem:[%s5514_s0 + $0xac] sm:$0xf0]  ;;  %v4403_v30 = vor.u32 %v3571_v23, %v2803_v22 }
  0x3e   :  { %933 = vmatpush.bf16.msrb.mxu2 %v2840_v59  ;;  %v3569_v28 = vld [vmem:[%s5514_s0 + $0x9c] sm:$0xf]  ;;  %v2813_v29 = vld [vmem:[%s5514_s0 + $0xb0] sm:$0xf0]  ;;  %v4405_v31 = vor.u32 %v3568_v24, %v2805_v25  ;;  %v4407_v32 = vor.u32 %v3572_v27, %v2811_v26  ;;  %v64_v38 = vld [vmem:[%s5514_s0 + $0xc0] sm:$0xff]  ;;  %vm713_vm0 = vcmask 261120  }
  0x3f   :  { %966 = vmatpush.bf16.msrb.mxu3 %v2904_v0  ;;  %v4409_v33 = vor.u32 %v3569_v28, %v2813_v29  ;;  %v3652_v34 = vld [vmem:[%s5515_s1 + $0x274] sm:$0xf]  ;;  %v3141_v35 = vld [vmem:[%s5515_s1 + $0x278] sm:$0xf0]  ;;  %v3650_v51 = vld [vmem:[%s5515_s1 + $0x264] sm:$0xf]  ;;  %v232_v1 = vunpack.c.l.b16 %v64_v38  ;;  %v233_v2 = vunpack.c.h.b16 %v64_v38 }
  0x40   :  { %867 = vmatpush.bf16.msrb.mxu0 %v3092_v63  ;;  %v3620_v36 = vld [vmem:[%s5515_s1 + $0x174] sm:$0xf]  ;;  %v3144_v42 = vor.u32 %v3652_v34, %v3141_v35  ;;  %v3013_v43 = vld [vmem:[%s5515_s1 + $0x178] sm:$0xf0]  ;;  %v3133_v55 = vld [vmem:[%s5515_s1 + $0x268] sm:$0xf0] }
  0x41   :  { %v3656_v44 = vld [vmem:[%s5515_s1 + $0x294] sm:$0xf]  ;;  %v3157_v45 = vld [vmem:[%s5515_s1 + $0x298] sm:$0xf0]  ;;  %v3016_v46 = vor.u32 %v3620_v36, %v3013_v43  ;;  %v3618_v56 = vld [vmem:[%s5515_s1 + $0x164] sm:$0xf]  ;;  %v3136_v60 = vor.u32 %v3650_v51, %v3133_v55  ;;  %v4463_v5 = vpack.c.b16 %v232_v1, %v232_v1  ;;  %v4465_v6 = vpack.c.b16 %v233_v2, %v233_v2 }
  0x42   :  { %934 = vmatpush.bf16.msrb.mxu2 %v2832_v16  ;;  %v3160_v47 = vor.u32 %v3656_v44, %v3157_v45  ;;  %v3636_v49 = vld [vmem:[%s5515_s1 + $0x1f4] sm:$0xf]  ;;  %v3077_v50 = vld [vmem:[%s5515_s1 + $0x1f8] sm:$0xf0]  ;;  %v3005_v58 = vld [vmem:[%s5515_s1 + $0x168] sm:$0xf0] }
  0x43   :  { %747 = vmatmul.bf16.gmra.mxu0 %v4349_v9  ;;  %967 = vmatpush.bf16.msrb.mxu3 %v2896_v21  ;;  %v3080_v52 = vor.u32 %v3636_v49, %v3077_v50  ;;  %v65_v59 = vld [vmem:[%s5514_s0 + $0xc8] sm:$0xff]  ;;  %v3008_v61 = vor.u32 %v3618_v56, %v3005_v58  ;;  %v3634_v62 = vld [vmem:[%s5515_s1 + $0x1e4] sm:$0xf]  ;;  %v3648_v13 = vld [vmem:[%s5515_s1 + $0x254] sm:$0xf]  ;;  %vm1238_vm1 = vcmask 1040384  }
  0x44   :  { %780 = vmatmul.bf16.gmra.mxu1 %v4351_v10  ;;  %868 = vmatpush.bf16.msrb.mxu0 %v3084_v20  ;;  %v3069_v63 = vld [vmem:[%s5515_s1 + $0x1e8] sm:$0xf0]  ;;  %v234_v3 = vunpack.c.l.b16 %v65_v59  ;;  %v235_v4 = vunpack.c.h.b16 %v65_v59  ;;  %v3125_v14 = vld [vmem:[%s5515_s1 + $0x258] sm:$0xf0]  ;;  %v3616_v15 = vld [vmem:[%s5515_s1 + $0x154] sm:$0xf] }
  0x45   :  { %813 = vmatmul.bf16.gmra.mxu2 %v4353_v11  ;;  %1026 = vmatpush.bf16.msra.mxu1 %v3080_v52  ;;  %v3072_v0 = vor.u32 %v3634_v62, %v3069_v63  ;;  %v3128_v16 = vor.u32 %v3648_v13, %v3125_v14  ;;  %v2997_v17 = vld [vmem:[%s5515_s1 + $0x158] sm:$0xf0]  ;;  %v3632_v18 = vld [vmem:[%s5515_s1 + $0x1d4] sm:$0xf]  ;;  %v3646_v22 = vld [vmem:[%s5515_s1 + $0x244] sm:$0xf] }
  0x46   :  { %846 = vmatmul.bf16.gmra.mxu3 %v4355_v12  ;;  %1059 = vmatpush.bf16.msra.mxu2 %v3144_v42  ;;  %v4467_v7 = vpack.c.b16 %v234_v3, %v234_v3  ;;  %v4469_v8 = vpack.c.b16 %v235_v4, %v235_v4  ;;  %v3061_v19 = vld [vmem:[%s5515_s1 + $0x1d8] sm:$0xf0]  ;;  %v3000_v20 = vor.u32 %v3616_v15, %v2997_v17  ;;  %v3117_v23 = vld [vmem:[%s5515_s1 + $0x248] sm:$0xf0]  ;;  %v2747_v25 = vld [vmem:[%s5514_s0 + $0x10] sm:$0xf] }
  0x47   :  { %1098 = vmatpush.bf16.msra.mxu3 %v3160_v47  ;;  %v3064_v21 = vor.u32 %v3632_v18, %v3061_v19  ;;  %v3120_v24 = vor.u32 %v3646_v22, %v3117_v23  ;;  %v3555_v26 = vld [vmem:[%s5514_s0 + $0x24] sm:$0xf0]  ;;  %v3552_v27 = vld [vmem:[%s5514_s0 + $0x14] sm:$0xf]  ;;  %v2749_v28 = vld [vmem:[%s5514_s0 + $0x28] sm:$0xf0] }
  0x48   :  { %993 = vmatpush.bf16.msra.mxu0 %v3016_v46  ;;  %v4511_v29 = vor.u32 %v3555_v26, %v2747_v25  ;;  %v4513_v34 = vor.u32 %v3552_v27, %v2749_v28  ;;  %v3614_v35 = vld [vmem:[%s5515_s1 + $0x144] sm:$0xf]  ;;  %v2989_v36 = vld [vmem:[%s5515_s1 + $0x148] sm:$0xf0]  ;;  %v3612_v46 = vld [vmem:[%s5515_s1 + $0x134] sm:$0xf] }
  0x49   :  { %1027 = vmatpush.bf16.msra.mxu1 %v3072_v0  ;;  %v3630_v38 = vld [vmem:[%s5515_s1 + $0x1c4] sm:$0xf]  ;;  %v2992_v42 = vor.u32 %v3614_v35, %v2989_v36  ;;  %v3053_v43 = vld [vmem:[%s5515_s1 + $0x1c8] sm:$0xf0]  ;;  %v2981_v47 = vld [vmem:[%s5515_s1 + $0x138] sm:$0xf0] }
  0x4a   :  { %1060 = vmatpush.bf16.msra.mxu2 %v3136_v60  ;;  %v3056_v44 = vor.u32 %v3630_v38, %v3053_v43  ;;  %v3654_v49 = vld [vmem:[%s5515_s1 + $0x284] sm:$0xf]  ;;  %v2984_v50 = vor.u32 %v3612_v46, %v2981_v47  ;;  %v3149_v51 = vld [vmem:[%s5515_s1 + $0x288] sm:$0xf0]  ;;  %v3628_v52 = vld [vmem:[%s5515_s1 + $0x1b4] sm:$0xf] }
  0x4b   :  { %v3045_v55 = vld [vmem:[%s5515_s1 + $0x1b8] sm:$0xf0]  ;;  %v3152_v56 = vor.u32 %v3654_v49, %v3149_v51  ;;  %v2771_v59 = vld [vmem:[%s5514_s0 + $0x40] sm:$0xf]  ;;  %v3561_v60 = vld [vmem:[%s5514_s0 + $0x54] sm:$0xf0] }
  0x4c   :  { %994 = vmatpush.bf16.msra.mxu0 %v3008_v61  ;;  %v3048_v58 = vor.u32 %v3628_v52, %v3045_v55  ;;  %v3558_v61 = vld [vmem:[%s5514_s0 + $0x44] sm:$0xf]  ;;  %v2773_v62 = vld [vmem:[%s5514_s0 + $0x58] sm:$0xf0]  ;;  %v4568_v63 = vor.u32 %v3561_v60, %v2771_v59  ;;  %v3101_v2 = vld [vmem:[%s5515_s1 + $0x228] sm:$0xf0] }
  0x4d   :  { %1028 = vmatpush.bf16.msra.mxu1 %v3064_v21  ;;  %1099 = vmatpush.bf16.msra.mxu3 %v3152_v56  ;;  %v4570_v0 = vor.u32 %v3558_v61, %v2773_v62  ;;  %v3642_v1 = vld [vmem:[%s5515_s1 + $0x224] sm:$0xf]  ;;  %v3037_v14 = vld [vmem:[%s5515_s1 + $0x1a8] sm:$0xf0]  ;;  %v2795_v15 = vld [vmem:[%s5514_s0 + $0x70] sm:$0xf] }
  0x4e   :  { %1061 = vmatpush.bf16.msra.mxu2 %v3128_v16  ;;  %v3104_v3 = vor.u32 %v3642_v1, %v3101_v2  ;;  %v3610_v4 = vld [vmem:[%s5515_s1 + $0x124] sm:$0xf]  ;;  %v3567_v16 = vld [vmem:[%s5514_s0 + $0x84] sm:$0xf0]  ;;  %v3564_v18 = vld [vmem:[%s5514_s0 + $0x74] sm:$0xf] }
  0x4f   :  { %v2797_v19 = vld [vmem:[%s5514_s0 + $0x88] sm:$0xf0]  ;;  %v3640_v22 = vld [vmem:[%s5515_s1 + $0x214] sm:$0xf]  ;;  %v3093_v23 = vld [vmem:[%s5515_s1 + $0x218] sm:$0xf0] }
  0x50   :  { %995 = vmatpush.bf16.msra.mxu0 %v3000_v20  ;;  %v4607_v20 = vor.u32 %v3567_v16, %v2795_v15  ;;  %v4609_v21 = vor.u32 %v3564_v18, %v2797_v19  ;;  %v3608_v25 = vld [vmem:[%s5515_s1 + $0x114] sm:$0xf]  ;;  %v2965_v26 = vld [vmem:[%s5515_s1 + $0x118] sm:$0xf0]  ;;  %v3085_v43 = vld [vmem:[%s5515_s1 + $0x208] sm:$0xf0] }
  0x51   :  { %1029 = vmatpush.bf16.msra.mxu1 %v3056_v44  ;;  %v2968_v27 = vor.u32 %v3608_v25, %v2965_v26  ;;  %v3624_v28 = vld [vmem:[%s5515_s1 + $0x194] sm:$0xf]  ;;  %v3029_v35 = vld [vmem:[%s5515_s1 + $0x198] sm:$0xf0]  ;;  %v2957_v44 = vld [vmem:[%s5515_s1 + $0x108] sm:$0xf0] }
  0x52   :  { %1062 = vmatpush.bf16.msra.mxu2 %v3120_v24  ;;  %v3096_v24 = vor.u32 %v3640_v22, %v3093_v23  ;;  %v3032_v36 = vor.u32 %v3624_v28, %v3029_v35  ;;  %v4637_v38 = vld [vmem:[%s5524_s10] ss:$8 sm:$0x3]  ;;  %v3021_v46 = vld [vmem:[%s5515_s1 + $0x188] sm:$0xf0]  ;;  %vm1159_vm2 = vcmask 130048  }
  0x53   :  { %752 = vmatmul.bf16.gmra.mxu0 %v4403_v30  ;;  %v4664_v47 = vperm.slane %v4637_v38, 0  ;;  %v3570_v49 = vld [vmem:[%s5514_s0 + $0xa4] sm:$0xf]  ;;  %s3854_s15 = smov 64   ;;  %s3855_s16 = smov 48   ;;  %vm1348_vm6 = vcmask 392192  }
  0x54   :  { %785 = vmatmul.bf16.gmra.mxu1 %v4405_v31  ;;  %996 = vmatpush.bf16.msra.mxu0 %v2992_v42  ;;  %v3638_v42 = vld [vmem:[%s5515_s1 + $0x204] sm:$0xf]  ;;  %s3856_s18 = smov 16   ;;  %s3858_s19 = smov 112   ;;  %vm1350_vm7 = vcmask 523264   ;;  %vm1352_vm8 = vcmask 654336  }
  0x55   :  { %818 = vmatmul.bf16.gmra.mxu2 %v4407_v32  ;;  %1030 = vmatpush.bf16.msra.mxu1 %v3048_v58  ;;  %s3859_s20 = smov 32   ;;  %s3860_s21 = smov 80   ;;  %vm1354_vm9 = vcmask 785408   ;;  %vm1356_vm10 = vcmask 916480   ;;  %vm2592_vm14 = vcmask 517120  }
  0x56   :  { %851 = vmatmul.bf16.gmra.mxu3 %v4409_v33 }
  0x58   :  { %997 = vmatpush.bf16.msra.mxu0 %v2984_v50  ;;  %v2821_v50 = vld [vmem:[%s5514_s0 + $0xb8] sm:$0xf0] }
  0x59   :  { %v4674_v58 = vor.u32 %v3570_v49, %v2821_v50 }
  0x63   :  { %757 = vmatmul.bf16.gmra.mxu0 %v4463_v5 }
  0x64   :  { %790 = vmatmul.bf16.gmra.mxu1 %v4465_v6 }
  0x65   :  { %823 = vmatmul.bf16.gmra.mxu2 %v4467_v7 }
  0x66   :  { %856 = vmatmul.bf16.gmra.mxu3 %v4469_v8 }
  0x73   :  { %869 = vmatmul.bf16.vlgmr.msrb.gmra.mxu0 %v4511_v29 }
  0x74   :  { %3161 = vmatmul.msk.bf16.vlgmr.msrb.gmra.mxu1 %vm713_vm0, %v4513_v34 }
  0x75   :  { %935 = vmatmul.bf16.vlgmr.msrb.gmra.mxu2 %v4160_v48  ;;  %v3644_v48 = vld [vmem:[%s5515_s1 + $0x234] sm:$0xf] }
  0x76   :  { %968 = vmatmul.bf16.vlgmr.msrb.gmra.mxu3 %v4171_v53  ;;  %v3109_v53 = vld [vmem:[%s5515_s1 + $0x238] sm:$0xf0] }
  0x77   :  { %v3112_v45 = vor.u32 %v3644_v48, %v3109_v53  ;;  %v3606_v48 = vld [vmem:[%s5515_s1 + $0x104] sm:$0xf]  ;;  %v3088_v53 = vor.u32 %v3638_v42, %v3085_v43 }
  0x78   :  { %v2960_v51 = vor.u32 %v3606_v48, %v2957_v44 }
  0x79   :  { %1063 = vmatpush.bf16.msra.mxu2 %v3112_v45  ;;  %v3622_v45 = vld [vmem:[%s5515_s1 + $0x184] sm:$0xf] }
  0x7a   :  { %v3024_v52 = vor.u32 %v3622_v45, %v3021_v46 }
  0x7d   :  { %1064 = vmatpush.bf16.msra.mxu2 %v3104_v3 }
  0x81   :  { %1065 = vmatpush.bf16.msra.mxu2 %v3096_v24 }
  0x83   :  { %874 = vmatmul.bf16.gmra.mxu0 %v4568_v63 }
  0x84   :  { %3162 = vmatmul.msk.bf16.gmra.mxu1 %vm713_vm0, %v4570_v0 }
  0x85   :  { %940 = vmatmul.bf16.gmra.mxu2 %v4277_v37  ;;  %v2973_v37 = vld [vmem:[%s5515_s1 + $0x128] sm:$0xf0] }
  0x86   :  { %973 = vmatmul.bf16.gmra.mxu3 %v4279_v39  ;;  %v2976_v13 = vor.u32 %v3610_v4, %v2973_v37  ;;  %v3626_v39 = vld [vmem:[%s5515_s1 + $0x1a4] sm:$0xf]  ;;  %1066 = vmatpush.bf16.msra.mxu2 %v3088_v53  ;;  %v66_v4 = vld [vmem:[%s5514_s0 + $0xd0] sm:$0xff] }
  0x87   :  { %v3040_v17 = vor.u32 %v3626_v39, %v3037_v14  ;;  %v236_v15 = vunpack.c.l.b16 %v66_v4  ;;  %v237_v16 = vunpack.c.h.b16 %v66_v4 }
  0x88   :  { %998 = vmatpush.bf16.msra.mxu0 %v2976_v13 }
  0x89   :  { %1031 = vmatpush.bf16.msra.mxu1 %v3040_v17  ;;  %v4690_v22 = vpack.c.b16 %v237_v16, %v237_v16 }
  0x8c   :  { %999 = vmatpush.bf16.msra.mxu0 %v2968_v27 }
  0x8d   :  { %1032 = vmatpush.bf16.msra.mxu1 %v3032_v36 }
  0x90   :  { %1000 = vmatpush.bf16.msra.mxu0 %v2960_v51 }
  0x91   :  { %1033 = vmatpush.bf16.msra.mxu1 %v3024_v52 }
  0x93   :  { %879 = vmatmul.bf16.gmra.mxu0 %v4607_v20 }
  0x94   :  { %3163 = vmatmul.msk.bf16.gmra.mxu1 %vm713_vm0, %v4609_v21 }
  0x95   :  { %945 = vmatmul.bf16.gmra.mxu2 %v4349_v9  ;;  %v2819_v9 = vld [vmem:[%s5514_s0 + $0xa0] sm:$0xf] }
  0x96   :  { %978 = vmatmul.bf16.gmra.mxu3 %v4351_v10  ;;  %v3573_v10 = vld [vmem:[%s5514_s0 + $0xb4] sm:$0xf0]  ;;  %s3857_s0 = smov 96  }
  0x97   :  { %v4672_v55 = vor.u32 %v3573_v10, %v2819_v9 }
  0xa0   :  { %v738_v56 = vpop.f32.mrf.mxu0 }
  0xa1   :  { %v739_v59 = vadd.f32 %v738_v56, %v4664_v47  ;;  %v771_v60 = vpop.f32.mrf.mxu1 }
  0xa3   :  { %v772_v61 = vadd.f32 %v771_v60, %v739_v59  ;;  %884 = vmatmul.bf16.gmra.mxu0 %v4672_v55 }
  0xa4   :  { %3164 = vmatmul.msk.bf16.gmra.mxu1 %vm713_vm0, %v4674_v58 }
  0xa5   :  { %950 = vmatmul.bf16.gmra.mxu2 %v4403_v30  ;;  %v4688_v30 = vpack.c.b16 %v236_v15, %v236_v15 }
  0xa6   :  { %983 = vmatmul.bf16.gmra.mxu3 %v4405_v31 }
  0xa8   :  { %v804_v62 = vpop.f32.mrf.mxu2  ;;  %v740_v3 = vpop.f32.mrf.mxu0 }
  0xa9   :  { %v805_v1 = vadd.f32 %v804_v62, %v772_v61  ;;  %v837_v2 = vpop.f32.mrf.mxu3  ;;  %v741_v37 = vadd.f32 %v740_v3, %v4664_v47  ;;  %v773_v13 = vpop.f32.mrf.mxu1 }
  0xab   :  { %v4686_v39 = vadd.f32 %v837_v2, %v805_v1  ;;  %v774_v14 = vadd.f32 %v773_v13, %v741_v37 }
  0xb0   :  { %v806_v17 = vpop.f32.mrf.mxu2  ;;  %v743_v19 = vpop.f32.mrf.mxu0 }
  0xb1   :  { %v807_v31 = vadd.f32 %v806_v17, %v774_v14  ;;  %v839_v18 = vpop.f32.mrf.mxu3  ;;  %v744_v23 = vadd.f32 %v743_v19, %v4664_v47  ;;  %v776_v24 = vpop.f32.mrf.mxu1 }
  0xb3   :  { %v4693_v25 = vadd.f32 %v839_v18, %v807_v31  ;;  %v777_v26 = vadd.f32 %v776_v24, %v744_v23  ;;  %889 = vmatmul.bf16.gmra.mxu0 %v4688_v30 }
  0xb4   :  { %3165 = vmatmul.msk.bf16.gmra.mxu1 %vm713_vm0, %v4690_v22 }
  0xb5   :  { %955 = vmatmul.bf16.gmra.mxu2 %v4463_v5 }
  0xb6   :  { %988 = vmatmul.bf16.gmra.mxu3 %v4465_v6 }
  0xb8   :  { %v809_v27 = vpop.f32.mrf.mxu2  ;;  %v745_v36 = vpop.f32.mrf.mxu0 }
  0xb9   :  { %v810_v28 = vadd.f32 %v809_v27, %v777_v26  ;;  %v842_v35 = vpop.f32.mrf.mxu3  ;;  %v746_v9 = vadd.f32 %v745_v36, %v4664_v47  ;;  %v778_v10 = vpop.f32.mrf.mxu1 }
  0xbb   :  { %v4701_v42 = vadd.f32 %v842_v35, %v810_v28  ;;  %v779_v43 = vadd.f32 %v778_v10, %v746_v9 }
  0xc0   :  { %v811_v48 = vpop.f32.mrf.mxu2  ;;  %v748_v45 = vpop.f32.mrf.mxu0 }
  0xc1   :  { %v812_v53 = vadd.f32 %v811_v48, %v779_v43  ;;  %v844_v44 = vpop.f32.mrf.mxu3  ;;  %v749_v46 = vadd.f32 %v748_v45, %v4664_v47  ;;  %v781_v49 = vpop.f32.mrf.mxu1 }
  0xc3   :  { %v4704_v5 = vadd.f32 %v844_v44, %v812_v53  ;;  %v782_v6 = vadd.f32 %v781_v49, %v749_v46  ;;  %1001 = vmatmul.bf16.vlgmr.msra.gmra.mxu0 %v4173_v54 }
  0xc4   :  { %1034 = vmatmul.bf16.vlgmr.msra.gmra.mxu1 %v4181_v57 }
  0xc5   :  { %1067 = vmatmul.bf16.vlgmr.msra.gmra.mxu2 %v4511_v29 }
  0xc6   :  { %3166 = vmatmul.msk.bf16.vlgmr.msra.gmra.mxu3 %vm713_vm0, %v4513_v34 }
  0xc8   :  { %v814_v50 = vpop.f32.mrf.mxu2  ;;  %v750_v56 = vpop.f32.mrf.mxu0 }
  0xc9   :  { %v815_v51 = vadd.f32 %v814_v50, %v782_v6  ;;  %v847_v52 = vpop.f32.mrf.mxu3  ;;  %v751_v59 = vadd.f32 %v750_v56, %v4664_v47  ;;  %v783_v60 = vpop.f32.mrf.mxu1  ;;  %v1253_v56 = vld [vmem:[%s5518_s4 + $0x60] sm:$0xff] }
  0xcb   :  { %v4712_v61 = vadd.f32 %v847_v52, %v815_v51  ;;  %v784_v62 = vadd.f32 %v783_v60, %v751_v59  ;;  %v1256_v51 = vld [vmem:[%s5518_s4 + $0x78] sm:$0xff] }
  0xcc   :  { %1262 = vmatpush.msrb.mxu0 %v1256_v51  ;;  %v1252_v60 = vld [vmem:[%s5518_s4 + $0x58] sm:$0xff] }
  0xd0   :  { %v816_v1 = vpop.f32.mrf.mxu2  ;;  %v753_v3 = vpop.f32.mrf.mxu0 }
  0xd1   :  { %v817_v2 = vadd.f32 %v816_v1, %v784_v62  ;;  %v849_v54 = vpop.f32.mrf.mxu3  ;;  %v754_v57 = vadd.f32 %v753_v3, %v4664_v47  ;;  %v786_v29 = vpop.f32.mrf.mxu1  ;;  %v1251_v62 = vld [vmem:[%s5518_s4 + $0x50] sm:$0xff]  ;;  %v1250_v1 = vld [vmem:[%s5518_s4 + $0x48] sm:$0xff] }
  0xd3   :  { %v4715_v4 = vadd.f32 %v849_v54, %v817_v2  ;;  %1006 = vmatmul.bf16.gmra.mxu0 %v4281_v40  ;;  %v787_v34 = vadd.f32 %v786_v29, %v754_v57  ;;  %v1249_v29 = vld [vmem:[%s5518_s4 + $0x40] sm:$0xff] }
  0xd4   :  { %1039 = vmatmul.bf16.gmra.mxu1 %v4283_v41 }
  0xd5   :  { %1072 = vmatmul.bf16.gmra.mxu2 %v4568_v63 }
  0xd6   :  { %3167 = vmatmul.msk.bf16.gmra.mxu3 %vm713_vm0, %v4570_v0 }
  0xd8   :  { %v819_v37 = vpop.f32.mrf.mxu2  ;;  %v755_v15 = vpop.f32.mrf.mxu0 }
  0xd9   :  { %v820_v13 = vadd.f32 %v819_v37, %v787_v34  ;;  %v852_v14 = vpop.f32.mrf.mxu3  ;;  %v756_v16 = vadd.f32 %v755_v15, %v4664_v47  ;;  %v788_v17 = vpop.f32.mrf.mxu1 }
  0xdb   :  { %v4723_v31 = vadd.f32 %v852_v14, %v820_v13  ;;  %v4725_v18 = vadd.f32 %v788_v17, %v756_v16  ;;  %v1248_v14 = vld [vmem:[%s5518_s4 + $0x38] sm:$0xff]  ;;  %v1247_v16 = vld [vmem:[%s5518_s4 + $0x30] sm:$0xff] }
  0xe0   :  { %v4727_v40 = vpop.f32.mrf.mxu2  ;;  %v758_v41 = vpop.f32.mrf.mxu0 }
  0xe1   :  { %v4729_v19 = vpop.f32.mrf.mxu3  ;;  %v759_v63 = vadd.f32 %v758_v41, %v4664_v47  ;;  %v791_v23 = vpop.f32.mrf.mxu1 }
  0xe3   :  { %1011 = vmatmul.bf16.gmra.mxu0 %v4353_v11  ;;  %v792_v0 = vadd.f32 %v791_v23, %v759_v63  ;;  %v4745_v11 = vperm.slane %v4637_v38, 1 }
  0xe4   :  { %1044 = vmatmul.bf16.gmra.mxu1 %v4355_v12 }
  0xe5   :  { %1077 = vmatmul.bf16.gmra.mxu2 %v4607_v20 }
  0xe6   :  { %3168 = vmatmul.msk.bf16.gmra.mxu3 %vm713_vm0, %v4609_v21 }
  0xe8   :  { %v824_v24 = vpop.f32.mrf.mxu2  ;;  %v760_v28 = vpop.f32.mrf.mxu0 }
  0xe9   :  { %v825_v26 = vadd.f32 %v824_v24, %v792_v0  ;;  %v857_v27 = vpop.f32.mrf.mxu3  ;;  %v793_v35 = vpop.f32.mrf.mxu1 }
  0xeb   :  { %v4737_v36 = vadd.f32 %v857_v27, %v825_v26 }
  0xf0   :  { %v826_v9 = vpop.f32.mrf.mxu2  ;;  %v870_v10 = vpop.f32.mrf.mxu0 }
  0xf1   :  { %v859_v47 = vpop.f32.mrf.mxu3  ;;  %v4739_v43 = vpop.f32.mrf.mxu1  ;;  %v871_v15 = vadd.f32 %v870_v10, %v4686_v39  ;;  %v822_v9 = vadd.f32 %v4727_v40, %v4725_v18 }
  0xf3   :  { %1016 = vmatmul.bf16.gmra.mxu0 %v4407_v32  ;;  %v904_v0 = vadd.f32 %v4739_v43, %v871_v15  ;;  %v1243_v43 = vld [vmem:[%s5518_s4 + $0x10] sm:$0xff]  ;;  %v855_v18 = vadd.f32 %v4729_v19, %v822_v9 }
  0xf4   :  { %1049 = vmatmul.bf16.gmra.mxu1 %v4409_v33 }
  0xf5   :  { %1082 = vmatmul.bf16.gmra.mxu2 %v4672_v55 }
  0xf6   :  { %3169 = vmatmul.msk.bf16.gmra.mxu3 %vm713_vm0, %v4674_v58 }
  0xf8   :  { %v936_v12 = vpop.f32.mrf.mxu2  ;;  %v872_v48 = vpop.f32.mrf.mxu0 }
  0xf9   :  { %v937_v20 = vadd.f32 %v936_v12, %v4745_v11  ;;  %v969_v21 = vpop.f32.mrf.mxu3  ;;  %v905_v53 = vpop.f32.mrf.mxu1  ;;  %v873_v37 = vadd.f32 %v872_v48, %v4693_v25  ;;  %v1246_v25 = vld [vmem:[%s5518_s4 + $0x28] sm:$0xff] }
  0xfa   :  { %v1242_v12 = vld [vmem:[%s5518_s4 + $0x8] sm:$0xff] }
  0xfb   :  { %v4750_v44 = vadd.f32 %v969_v21, %v937_v20  ;;  %v906_v41 = vadd.f32 %v905_v53, %v873_v37 }
  0xfd   :  { %v4817_v35 = vmax.f32 %v906_v41, 0.0 }
 0x100   :  { %v4752_v45 = vpop.f32.mrf.mxu2  ;;  %v875_v33 = vpop.f32.mrf.mxu0 }
 0x101   :  { %v4754_v32 = vpop.f32.mrf.mxu3  ;;  %v908_v55 = vpop.f32.mrf.mxu1  ;;  %v876_v17 = vadd.f32 %v875_v33, %v4701_v42  ;;  %v1245_v42 = vld [vmem:[%s5518_s4 + $0x20] sm:$0xff] }
 0x103   :  { %1021 = vmatmul.bf16.gmra.mxu0 %v4467_v7  ;;  %v1255_v7 = vld [vmem:[%s5518_s4 + $0x70] sm:$0xff]  ;;  %v909_v26 = vadd.f32 %v908_v55, %v876_v17 }
 0x104   :  { %1054 = vmatmul.bf16.gmra.mxu1 %v4469_v8  ;;  %1263 = vmatpush.msrb.mxu0 %v1255_v7  ;;  %v1254_v8 = vld [vmem:[%s5518_s4 + $0x68] sm:$0xff] }
 0x105   :  { %1087 = vmatmul.bf16.gmra.mxu2 %v4688_v30  ;;  %v4833_v20 = vmax.f32 %v909_v26, 0.0 }
 0x106   :  { %3170 = vmatmul.msk.bf16.gmra.mxu3 %vm713_vm0, %v4690_v22  ;;  %1264 = vmatpush.msrb.mxu0 %v1254_v8 }
 0x107   :  { %v1187_v19 = vmul.f32 %v4833_v20, %v4833_v20 }
 0x108   :  { %v941_v38 = vpop.f32.mrf.mxu2  ;;  %v877_v49 = vpop.f32.mrf.mxu0  ;;  %1265 = vmatpush.msrb.mxu0 %v1253_v56 }
 0x109   :  { %v942_v58 = vadd.f32 %v941_v38, %v4745_v11  ;;  %v974_v46 = vpop.f32.mrf.mxu3  ;;  %v910_v6 = vpop.f32.mrf.mxu1  ;;  %v878_v63 = vadd.f32 %v877_v49, %v4704_v5  ;;  %v1244_v5 = vld [vmem:[%s5518_s4 + $0x18] sm:$0xff]  ;;  %v1241_v49 = vld [vmem:[%s5518_s4] sm:$0xff] }
 0x10a   :  { %1266 = vmatpush.msrb.mxu0 %v1252_v60 }
 0x10b   :  { %v4762_v50 = vadd.f32 %v974_v46, %v942_v58  ;;  %v911_v47 = vadd.f32 %v910_v6, %v878_v63 }
 0x10c   :  { %1267 = vmatpush.msrb.mxu0 %v1251_v62 }
 0x10d   :  { %v4839_v40 = vmax.f32 %v911_v47, 0.0 }
 0x10e   :  { %1268 = vmatpush.msrb.mxu0 %v1250_v1 }
 0x10f   :  { %v1189_v60 = vmul.f32 %v4839_v40, %v4839_v40 }
 0x110   :  { %v4773_v30 = vpop.f32.mrf.mxu2  ;;  %v880_v52 = vpop.f32.mrf.mxu0  ;;  %1269 = vmatpush.msrb.mxu0 %v1249_v29 }
 0x111   :  { %v4775_v22 = vpop.f32.mrf.mxu3  ;;  %v913_v59 = vpop.f32.mrf.mxu1  ;;  %v881_v27 = vadd.f32 %v880_v52, %v4712_v61  ;;  %v4828_v61 = vmax.f32 %v904_v0, 0.0 }
 0x112   :  { %1270 = vmatpush.msrb.mxu0 %v1248_v14 }
 0x113   :  { %v914_v21 = vadd.f32 %v913_v59, %v881_v27  ;;  %v1183_v55 = vmul.f32 %v4828_v61, %v4828_v61  ;;  %v1145_v38 = vadd.f32 %v4817_v35, %v4828_v61 }
 0x114   :  { %1271 = vmatpush.msrb.mxu0 %v1247_v16 }
 0x115   :  { %v4851_v6 = vmax.f32 %v914_v21, 0.0  ;;  %v1146_v59 = vadd.f32 %v1145_v38, %v4833_v20 }
 0x116   :  { %1272 = vmatpush.msrb.mxu0 %v1246_v25 }
 0x118   :  { %v946_v2 = vpop.f32.mrf.mxu2  ;;  %v882_v57 = vpop.f32.mrf.mxu0  ;;  %1273 = vmatpush.msrb.mxu0 %v1245_v42 }
 0x119   :  { %v947_v54 = vadd.f32 %v946_v2, %v4745_v11  ;;  %v979_v3 = vpop.f32.mrf.mxu3  ;;  %v915_v34 = vpop.f32.mrf.mxu1  ;;  %v883_v10 = vadd.f32 %v882_v57, %v4715_v4  ;;  %v1185_v4 = vmul.f32 %v4817_v35, %v4817_v35 }
 0x11a   :  { %1274 = vmatpush.msrb.mxu0 %v1244_v5 }
 0x11b   :  { %v4794_v13 = vadd.f32 %v979_v3, %v947_v54  ;;  %v916_v53 = vadd.f32 %v915_v34, %v883_v10  ;;  %v1201_v52 = vadd.f32 %v1185_v4, %v1183_v55  ;;  %v1147_v54 = vadd.f32 %v1146_v59, %v4839_v40  ;;  %v1258_v55 = vld [vmem:[%s5518_s4 + $0x88] sm:$0xff] }
 0x11c   :  { %1275 = vmatpush.msrb.mxu0 %v1243_v43  ;;  %v1191_v3 = vmul.f32 %v4851_v6, %v4851_v6  ;;  %1296 = vmatpush.msrb.mxu1 %v1258_v55 }
 0x11d   :  { %v4858_v62 = vmax.f32 %v916_v53, 0.0  ;;  %v1202_v2 = vadd.f32 %v1201_v52, %v1187_v19  ;;  %v1148_v34 = vadd.f32 %v1147_v54, %v4851_v6 }
 0x11e   :  { %1276 = vmatpush.msrb.mxu0 %v1242_v12 }
 0x11f   :  { %v1203_v29 = vadd.f32 %v1202_v2, %v1189_v60  ;;  %v1193_v37 = vmul.f32 %v4858_v62, %v4858_v62  ;;  %v1149_v25 = vadd.f32 %v1148_v34, %v4858_v62 }
 0x120   :  { %v4808_v23 = vpop.f32.mrf.mxu2  ;;  %v885_v24 = vpop.f32.mrf.mxu0  ;;  %1277 = vmatpush.msrb.mxu0 %v1241_v49 }
 0x121   :  { %v4811_v39 = vpop.f32.mrf.mxu3  ;;  %v918_v28 = vpop.f32.mrf.mxu1  ;;  %v886_v48 = vadd.f32 %v885_v24, %v4723_v31  ;;  %v1204_v41 = vadd.f32 %v1203_v29, %v1191_v3 }
 0x123   :  { %v919_v51 = vadd.f32 %v918_v28, %v886_v48  ;;  %v1205_v42 = vadd.f32 %v1204_v41, %v1193_v37 }
 0x125   :  { %v4863_v57 = vmax.f32 %v919_v51, 0.0 }
 0x127   :  { %v1195_v63 = vmul.f32 %v4863_v57, %v4863_v57  ;;  %v1150_v26 = vadd.f32 %v1149_v25, %v4863_v57 }
 0x128   :  { %v951_v33 = vpop.f32.mrf.mxu2  ;;  %v887_v46 = vpop.f32.mrf.mxu0 }
 0x129   :  { %v952_v58 = vadd.f32 %v951_v33, %v4745_v11  ;;  %v984_v31 = vpop.f32.mrf.mxu3  ;;  %v888_v7 = vadd.f32 %v887_v46, %v855_v18  ;;  %v920_v8 = vpop.f32.mrf.mxu1  ;;  %v1206_v5 = vadd.f32 %v1205_v42, %v1195_v63 }
 0x12b   :  { %v4853_v56 = vadd.f32 %v984_v31, %v952_v58  ;;  %v921_v1 = vadd.f32 %v920_v8, %v888_v7 }
 0x12d   :  { %v4868_v14 = vmax.f32 %v921_v1, 0.0 }
 0x12f   :  { %v1197_v27 = vmul.f32 %v4868_v14, %v4868_v14  ;;  %v1151_v9 = vadd.f32 %v1150_v26, %v4868_v14 }
 0x130   :  { %v4870_v15 = vpop.f32.mrf.mxu2  ;;  %v890_v17 = vpop.f32.mrf.mxu0 }
 0x131   :  { %v4872_v16 = vpop.f32.mrf.mxu3  ;;  %v891_v0 = vadd.f32 %v890_v17, %v4737_v36  ;;  %v923_v24 = vpop.f32.mrf.mxu1  ;;  %v1207_v10 = vadd.f32 %v1206_v5, %v1197_v27 }
 0x133   :  { %v924_v28 = vadd.f32 %v923_v24, %v891_v0 }
 0x135   :  { %v4882_v47 = vmax.f32 %v924_v28, 0.0 }
 0x137   :  { %v1152_v43 = vadd.f32 %v1151_v9, %v4882_v47  ;;  %v1199_v12 = vmul.f32 %v4882_v47, %v4882_v47 }
 0x138   :  { %v956_v36 = vpop.f32.mrf.mxu2  ;;  %v892_v4 = vpop.f32.mrf.mxu0 }
 0x139   :  { %v957_v21 = vadd.f32 %v956_v36, %v4745_v11  ;;  %v989_v48 = vpop.f32.mrf.mxu3  ;;  %v1153_v18 = vrot.slane %v1152_v43, 4  ;;  %v1208_v53 = vadd.f32 %v1207_v10, %v1199_v12  ;;  %v925_v33 = vpop.f32.mrf.mxu1  ;;  %v1257_v12 = vld [vmem:[%s5518_s4 + $0x80] sm:$0xff]  ;;  %v939_v36 = vadd.f32 %v4752_v45, %v4745_v11 }
 0x13a   :  { %1297 = vmatpush.msrb.mxu1 %v1257_v12  ;;  %v944_v4 = vadd.f32 %v4773_v30, %v4745_v11 }
 0x13b   :  { %v4891_v38 = vadd.f32 %v989_v48, %v957_v21  ;;  %v1154_v58 = vadd.f32 %v1153_v18, %v1152_v43  ;;  %v1209_v31 = vrot.slane %v1208_v53, 4  ;;  %v972_v21 = vadd.f32 %v4754_v32, %v939_v36 }
 0x13d   :  { %v1155_v46 = vrot.slane %v1154_v58, 2  ;;  %v1210_v49 = vadd.f32 %v1209_v31, %v1208_v53 }
 0x13f   :  { %v1156_v19 = vadd.f32 %v1155_v46, %v1154_v58  ;;  %v1211_v51 = vrot.slane %v1210_v49, 2  ;;  %v977_v46 = vadd.f32 %v4775_v22, %v944_v4 }
 0x140   :  { %v958_v7 = vpop.f32.mrf.mxu2  ;;  %v1002_v52 = vpop.f32.mrf.mxu0 }
 0x141   :  { %v991_v8 = vpop.f32.mrf.mxu3  ;;  %v1157_v59 = vrot.slane %v1156_v19, 1  ;;  %v1212_v60 = vadd.f32 %v1211_v51, %v1210_v49  ;;  %v1035_v1 = vpop.f32.mrf.mxu1  ;;  %v1003_v58 = vadd.f32 %v1002_v52, %v4750_v44  ;;  %v949_v49 = vadd.f32 %v4808_v23, %v4745_v11 }
 0x142   :  { %v954_v23 = vadd.f32 %v4870_v15, %v4745_v11 }
 0x143   :  { %v1213_v2 = vrot.slane %v1212_v60, 1  ;;  %v1158_v54 = vadd.f32 %v1157_v59, %v1156_v19  ;;  %v1036_v32 = vadd.f32 %v1035_v1, %v1003_v58  ;;  %v982_v30 = vadd.f32 %v4811_v39, %v949_v49 }
 0x145   :  { %v1214_v3 = vadd.f32 %v1213_v2, %v1212_v60 }
 0x147   :  { %v1239_v34 = vsel %vm1238_vm1, %v1158_v54, %v1214_v3 }
 0x148   :  { %v1068_v29 = vpop.f32.mrf.mxu2  ;;  %v1004_v17 = vpop.f32.mrf.mxu0  ;;  %1278 = vmatmul.f32.vlgmr.msrb.gmra.mxu0 %v1239_v34 }
 0x149   :  { %v1101_v37 = vpop.f32.mrf.mxu3  ;;  %v1037_v41 = vpop.f32.mrf.mxu1  ;;  %v1005_v33 = vadd.f32 %v1004_v17, %v972_v21  ;;  %v1069_v44 = vadd.f32 %v1068_v29, %v1036_v32  ;;  %v987_v29 = vadd.f32 %v4872_v16, %v954_v23 }
 0x14b   :  { %v1038_v45 = vadd.f32 %v1037_v41, %v1005_v33  ;;  %v1102_v41 = vadd.f32 %v1101_v37, %v1069_v44 }
 0x14d   :  { %v4915_v12 = vmax.f32 %v1102_v41, 0.0 }
 0x150   :  { %v1070_v25 = vpop.f32.mrf.mxu2  ;;  %v1007_v0 = vpop.f32.mrf.mxu0 }
 0x151   :  { %v1103_v63 = vpop.f32.mrf.mxu3  ;;  %v1040_v24 = vpop.f32.mrf.mxu1  ;;  %v1008_v31 = vadd.f32 %v1007_v0, %v4762_v50  ;;  %v1071_v51 = vadd.f32 %v1070_v25, %v1038_v45 }
 0x153   :  { %v1041_v7 = vadd.f32 %v1040_v24, %v1008_v31  ;;  %v1104_v3 = vadd.f32 %v1103_v63, %v1071_v51 }
 0x158   :  { %v1073_v42 = vpop.f32.mrf.mxu2  ;;  %v1009_v27 = vpop.f32.mrf.mxu0 }
 0x159   :  { %v1106_v26 = vpop.f32.mrf.mxu3  ;;  %v1042_v28 = vpop.f32.mrf.mxu1  ;;  %v1010_v19 = vadd.f32 %v1009_v27, %v977_v46  ;;  %v1074_v52 = vadd.f32 %v1073_v42, %v1041_v7 }
 0x15b   :  { %v1043_v54 = vadd.f32 %v1042_v28, %v1010_v19  ;;  %v1107_v25 = vadd.f32 %v1106_v26, %v1074_v52 }
 0x15d   :  { %v4917_v11 = vmax.f32 %v1107_v25, 0.0 }
 0x15f   :  { %v1188_v36 = vmul.f32 %v4917_v11, %v4917_v11  ;;  %v1163_v58 = vsel %vm1159_vm2, %v4917_v11, 0.0 }
 0x160   :  { %v1075_v5 = vpop.f32.mrf.mxu2  ;;  %v1012_v10 = vpop.f32.mrf.mxu0 }
 0x161   :  { %v1108_v9 = vpop.f32.mrf.mxu3  ;;  %v1045_v43 = vpop.f32.mrf.mxu1  ;;  %v1013_v59 = vadd.f32 %v1012_v10, %v4794_v13  ;;  %v1076_v34 = vadd.f32 %v1075_v5, %v1043_v54  ;;  %v4912_v13 = vmax.f32 %v1104_v3, 0.0  ;;  %v1218_v7 = vsel %vm1159_vm2, %v1188_v36, 0.0 }
 0x163   :  { %v1046_v1 = vadd.f32 %v1045_v43, %v1013_v59  ;;  %v1109_v42 = vadd.f32 %v1108_v9, %v1076_v34  ;;  %v1186_v5 = vmul.f32 %v4912_v13, %v4912_v13  ;;  %v1184_v9 = vmul.f32 %v4915_v12, %v4915_v12 }
 0x164   :  { %v1161_v21 = vsel %vm1159_vm2, %v4912_v13, 0.0 }
 0x165   :  { %v4921_v43 = vmax.f32 %v1109_v42, 0.0  ;;  %v1216_v33 = vsel %vm1159_vm2, %v1186_v5, 0.0  ;;  %v1215_v32 = vsel %vm1159_vm2, %v1184_v9, 0.0 }
 0x166   :  { %v1217_v52 = vadd.f32 %v1216_v33, %v1215_v32 }
 0x167   :  { %v1190_v31 = vmul.f32 %v4921_v43, %v4921_v43 }
 0x168   :  { %v1078_v48 = vpop.f32.mrf.mxu2  ;;  %v1014_v53 = vpop.f32.mrf.mxu0  ;;  %v1219_v34 = vadd.f32 %v1218_v7, %v1217_v52 }
 0x169   :  { %v1111_v18 = vpop.f32.mrf.mxu3  ;;  %v1047_v55 = vpop.f32.mrf.mxu1  ;;  %v1015_v22 = vadd.f32 %v1014_v53, %v982_v30  ;;  %v1079_v39 = vadd.f32 %v1078_v48, %v1046_v1  ;;  %v1160_v53 = vsel %vm1159_vm2, %v4915_v12, 0.0  ;;  %v1220_v54 = vsel %vm1159_vm2, %v1190_v31, 0.0 }
 0x16a   :  { %v1162_v51 = vadd.f32 %v1161_v21, %v1160_v53 }
 0x16b   :  { %v1048_v0 = vadd.f32 %v1047_v55, %v1015_v22 }
 0x170   :  { %v1080_v8 = vpop.f32.mrf.mxu2  ;;  %v1017_v2 = vpop.f32.mrf.mxu0 }
 0x171   :  { %v1113_v60 = vpop.f32.mrf.mxu3  ;;  %v1050_v50 = vpop.f32.mrf.mxu1  ;;  %v1018_v17 = vadd.f32 %v1017_v2, %v4853_v56  ;;  %v1081_v27 = vadd.f32 %v1080_v8, %v1048_v0  ;;  %v1112_v56 = vadd.f32 %v1111_v18, %v1079_v39  ;;  %v1165_v8 = vsel %vm1159_vm2, %v4921_v43, 0.0 }
 0x172   :  { %v1221_v39 = vadd.f32 %v1220_v54, %v1219_v34 }
 0x173   :  { %v1051_v28 = vadd.f32 %v1050_v50, %v1018_v17  ;;  %v1114_v16 = vadd.f32 %v1113_v60, %v1081_v27  ;;  %v4929_v48 = vmax.f32 %v1112_v56, 0.0  ;;  %v1164_v50 = vadd.f32 %v1163_v58, %v1162_v51 }
 0x175   :  { %v4938_v46 = vmax.f32 %v1114_v16, 0.0  ;;  %v1192_v59 = vmul.f32 %v4929_v48, %v4929_v48  ;;  %v1167_v22 = vsel %vm1159_vm2, %v4929_v48, 0.0  ;;  %v1166_v1 = vadd.f32 %v1165_v8, %v1164_v50 }
 0x177   :  { %v1194_v3 = vmul.f32 %v4938_v46, %v4938_v46  ;;  %v1222_v17 = vsel %vm1159_vm2, %v1192_v59, 0.0  ;;  %v1169_v41 = vsel %vm1159_vm2, %v4938_v46, 0.0  ;;  %v1168_v0 = vadd.f32 %v1167_v22, %v1166_v1 }
 0x178   :  { %v1083_v24 = vpop.f32.mrf.mxu2  ;;  %v1019_v10 = vpop.f32.mrf.mxu0 }
 0x179   :  { %v1116_v63 = vpop.f32.mrf.mxu3  ;;  %v1052_v15 = vpop.f32.mrf.mxu1  ;;  %v1084_v37 = vadd.f32 %v1083_v24, %v1051_v28  ;;  %v1020_v26 = vadd.f32 %v1019_v10, %v987_v29  ;;  %v1224_v29 = vsel %vm1159_vm2, %v1194_v3, 0.0  ;;  %v1170_v56 = vadd.f32 %v1169_v41, %v1168_v0 }
 0x17b   :  { %v1117_v4 = vadd.f32 %v1116_v63, %v1084_v37  ;;  %v1053_v18 = vadd.f32 %v1052_v15, %v1020_v26  ;;  %v1223_v15 = vadd.f32 %v1222_v17, %v1221_v39 }
 0x17d   :  { %v4946_v60 = vmax.f32 %v1117_v4, 0.0  ;;  %v1225_v9 = vadd.f32 %v1224_v29, %v1223_v15 }
 0x17f   :  { %v1171_v42 = vsel %vm1159_vm2, %v4946_v60, 0.0 }
 0x180   :  { %v1085_v55 = vpop.f32.mrf.mxu2  ;;  %v1022_v19 = vpop.f32.mrf.mxu0  ;;  %v1172_v36 = vadd.f32 %v1171_v42, %v1170_v56 }
 0x181   :  { %v1086_v49 = vadd.f32 %v1085_v55, %v1053_v18  ;;  %v1118_v45 = vpop.f32.mrf.mxu3  ;;  %v1055_v30 = vpop.f32.mrf.mxu1  ;;  %v1023_v44 = vadd.f32 %v1022_v19, %v4891_v38  ;;  %v1196_v38 = vmul.f32 %v4946_v60, %v4946_v60 }
 0x183   :  { %v1119_v2 = vadd.f32 %v1118_v45, %v1086_v49  ;;  %v1056_v25 = vadd.f32 %v1055_v30, %v1023_v44  ;;  %v1226_v26 = vsel %vm1159_vm2, %v1196_v38, 0.0 }
 0x184   :  { %v1227_v18 = vadd.f32 %v1226_v26, %v1225_v9 }
 0x185   :  { %v4954_v23 = vmax.f32 %v1119_v2, 0.0 }
 0x187   :  { %v1198_v27 = vmul.f32 %v4954_v23, %v4954_v23  ;;  %v1173_v5 = vsel %vm1159_vm2, %v4954_v23, 0.0 }
 0x188   :  { %v1088_v24 = vpop.f32.mrf.mxu2  ;;  %v1024_v10 = vpop.f32.mrf.mxu0  ;;  %v1174_v53 = vadd.f32 %v1173_v5, %v1172_v36  ;;  %v1144_v5 = vld [vmem:[%s5524_s10 + $0x2] ss:$0 sm:$0xff] }
 0x189   :  { %v1089_v28 = vadd.f32 %v1088_v24, %v1056_v25  ;;  %v1121_v63 = vpop.f32.mrf.mxu3  ;;  %v1057_v37 = vpop.f32.mrf.mxu1  ;;  %v1228_v21 = vsel %vm1159_vm2, %v1198_v27, 0.0  ;;  %v1143_v10 = vld [vmem:[%s5524_s10 + $0x1] ss:$0 sm:$0xff] }
 0x18a   :  { %v1229_v58 = vadd.f32 %v1228_v21, %v1227_v18 }
 0x18b   :  { %v1122_v16 = vadd.f32 %v1121_v63, %v1089_v28 }
 0x18d   :  { %v4970_v4 = vmax.f32 %v1122_v16, 0.0 }
 0x18f   :  { %v1175_v33 = vsel %vm1159_vm2, %v4970_v4, 0.0  ;;  %v1200_v55 = vmul.f32 %v4970_v4, %v4970_v4 }
 0x190   :  { %v1176_v31 = vadd.f32 %v1175_v33, %v1174_v53  ;;  %v1090_v49 = vpop.f32.mrf.mxu2 }
 0x191   :  { %v1230_v45 = vsel %vm1159_vm2, %v1200_v55, 0.0  ;;  %v1123_v19 = vpop.f32.mrf.mxu3 }
 0x192   :  { %v1177_v32 = vrot.slane %v1176_v31, 4  ;;  %v1231_v51 = vadd.f32 %v1230_v45, %v1229_v58 }
 0x194   :  { %v1178_v7 = vadd.f32 %v1177_v32, %v1176_v31  ;;  %v1232_v8 = vrot.slane %v1231_v51, 4 }
 0x196   :  { %v1179_v30 = vrot.slane %v1178_v7, 2  ;;  %v1233_v59 = vadd.f32 %v1232_v8, %v1231_v51  ;;  %v3665_v51 = vld [vmem:[%s5516_s2 + $0x38] sm:$0xff]  ;;  %v3663_v8 = vld [vmem:[%s5516_s2 + $0x28] sm:$0xff] }
 0x197   :  { %1918 = vmatpush.bf16.msrb.mxu2 %v3665_v51 }
 0x198   :  { %v1180_v2 = vadd.f32 %v1179_v30, %v1178_v7  ;;  %v1234_v44 = vrot.slane %v1233_v59, 2  ;;  %v3664_v7 = vld [vmem:[%s5516_s2 + $0x30] sm:$0xff]  ;;  %v3661_v30 = vld [vmem:[%s5516_s2 + $0x18] sm:$0xff] }
 0x19a   :  { %v1181_v52 = vrot.slane %v1180_v2, 1  ;;  %v1235_v50 = vadd.f32 %v1234_v44, %v1233_v59  ;;  %v3660_v59 = vld [vmem:[%s5516_s2 + $0x10] sm:$0xff] }
 0x19b   :  { %1919 = vmatpush.bf16.msrb.mxu2 %v3664_v7 }
 0x19c   :  { %v1236_v54 = vrot.slane %v1235_v50, 1  ;;  %v1182_v22 = vadd.f32 %v1181_v52, %v1180_v2  ;;  %v3659_v52 = vld [vmem:[%s5516_s2 + $0x8] sm:$0xff] }
 0x19e   :  { %v1237_v3 = vadd.f32 %v1236_v54, %v1235_v50  ;;  %v3658_v54 = vld [vmem:[%s5516_s2] sm:$0xff] }
 0x19f   :  { %1920 = vmatpush.bf16.msrb.mxu2 %v3663_v8 }
 0x1a0   :  { %v1240_v34 = vsel %vm1238_vm1, %v1182_v22, %v1237_v3 }
 0x1a1   :  { %3171 = vmatmul.msk.f32.vlgmr.msrb.gmra.mxu1 %vm1159_vm2, %v1240_v34 }
 0x1c5   :  { %v1279_v1 = vpop.f32.mrf.mxu0 }
 0x21e   :  { %v1299_v17 = vpop.f32.mrf.mxu1 }
 0x21f   :  { %v1300_v41 = vadd.f32 %v1299_v17, %v1279_v1 }
 0x221   :  { %v1302_v38 = vmul.f32 0.0015432099, %v1300_v41 }
 0x223   :  { %v1303_v25 = vmul.f32 %v1302_v38, %v1302_v38 }
 0x225   :  { %v1305_v39 = vrot.slane %v1303_v25, 7 }
 0x227   :  { %v1307_v0 = vsub.f32 %v1302_v38, %v1305_v39 }
 0x229   :  { %v1308_v24 = vadd.f32 1e-05, %v1307_v0 }
 0x22b   :  { %3820 = vrsqrt.f32 %v1308_v24  ;;  %vm1315_vm4 = vweird.f32 %v1308_v24 }
 0x231   :  { %v3821_v29 = vpop.eup %3820 }
 0x232   :  { %v1310_v42 = vmul.f32 %v3821_v29, %v1308_v24  ;;  %vm1316_vm3 = vweird.f32 %v3821_v29 }
 0x233   :  { %vm1317_vm5 = vmor %vm1315_vm4, %vm1316_vm3  ;;  %vm2711_vm4 = vcmask 25600  }
 0x234   :  { %v1311_v27 = vmul.f32 %v3821_v29, %v1310_v42 }
 0x236   :  { %v1312_v28 = vmul.f32 0.5, %v1311_v27 }
 0x238   :  { %v1313_v63 = vsub.f32 1.5, %v1312_v28 }
 0x23a   :  { %v1314_v15 = vmul.f32 %v3821_v29, %v1313_v63 }
 0x23c   :  { %v1318_v56 = vsel %vm1317_vm5, %v3821_v29, %v1314_v15  ;;  %v3673_v15 = vld [vmem:[%s5516_s2 + $0x78] sm:$0xff] }
 0x23d   :  { %v4982_v37 = vmul.f32 %v1318_v56, %v1143_v10  ;;  %1936 = vmatpush.bf16.msrb.mxu3 %v3673_v15  ;;  %v3694_v15 = vld [vmem:[%s5516_s2 + $0x120] sm:$0xff] }
 0x23f   :  { %v1321_v26 = vrot.slane %v4982_v37, 1  ;;  %1334 = vrot.lane.b32.xlu2 %v4982_v37, %s3854_s15  ;;  %1331 = vrot.lane.b32.xlu1 %v4982_v37, %s3855_s16  ;;  %v1359_v9 = vperm.slane %v4982_v37, 1 }
 0x240   :  { %1325 = vrot.lane.b32.xlu0 %v4982_v37, %s3856_s18 }
 0x241   :  { %v1323_v16 = vmul.f32 %v1321_v26, %v1302_v38  ;;  %v1363_v18 = vmul.f32 %v1359_v9, %v4912_v13  ;;  %v1371_v53 = vmul.f32 %v1359_v9, %v4938_v46  ;;  %v1365_v33 = vmul.f32 %v1359_v9, %v4917_v11 }
 0x242   :  { %v1369_v55 = vmul.f32 %v1359_v9, %v4929_v48  ;;  %v1373_v58 = vmul.f32 %v1359_v9, %v4946_v60  ;;  %v1375_v31 = vmul.f32 %v1359_v9, %v4954_v23  ;;  %v1377_v49 = vmul.f32 %v1359_v9, %v4970_v4 }
 0x243   :  { %v4995_v36 = vsub.f32 %v1144_v5, %v1323_v16  ;;  %v1361_v11 = vmul.f32 %v1359_v9, %v4915_v12  ;;  %v1367_v12 = vmul.f32 %v1359_v9, %v4921_v43  ;;  %v3662_v43 = vld [vmem:[%s5516_s2 + $0x20] sm:$0xff] }
 0x244   :  { %1921 = vmatpush.bf16.msrb.mxu2 %v3662_v43 }
 0x245   :  { %v1408_v21 = vperm.slane %v4995_v36, 0 }
 0x247   :  { %1340 = vrot.lane.b32.xlu2 %v4982_v37, %s3857_s0  ;;  %1343 = vrot.lane.b32.xlu1 %v4982_v37, %s3858_s19  ;;  %v5008_v13 = vadd.f32 %v1408_v21, %v1363_v18  ;;  %v5010_v46 = vadd.f32 %v1408_v21, %v1371_v53  ;;  %v5015_v48 = vadd.f32 %v1408_v21, %v1365_v33 }
 0x248   :  { %1328 = vrot.lane.b32.xlu0 %v4982_v37, %s3859_s20  ;;  %v5017_v60 = vadd.f32 %v1408_v21, %v1369_v55  ;;  %v5019_v23 = vadd.f32 %v1408_v21, %v1373_v58  ;;  %v5021_v4 = vadd.f32 %v1408_v21, %v1375_v31  ;;  %v5023_v45 = vadd.f32 %v1408_v21, %v1377_v49 }
 0x249   :  { %v5025_v19 = vadd.f32 %v1408_v21, %v1361_v11  ;;  %v5041_v32 = vadd.f32 %v1408_v21, %v1367_v12  ;;  %1922 = vmatpush.bf16.msrb.mxu2 %v3661_v30 }
 0x24d   :  { %1923 = vmatpush.bf16.msrb.mxu2 %v3660_v59 }
 0x24f   :  { %1382 = vrot.lane.b32.xlu2 %v4995_v36, %s3859_s20  ;;  %1379 = vrot.lane.b32.xlu1 %v4995_v36, %s3856_s18 }
 0x250   :  { %1337 = vrot.lane.b32.xlu0 %v4982_v37, %s3860_s21 }
 0x251   :  { %1924 = vmatpush.bf16.msrb.mxu2 %v3659_v52 }
 0x255   :  { %1925 = vmatpush.bf16.msrb.mxu2 %v3658_v54 }
 0x257   :  { %1391 = vrot.lane.b32.xlu2 %v4995_v36, %s3860_s21  ;;  %1385 = vrot.lane.b32.xlu1 %v4995_v36, %s3855_s16 }
 0x258   :  { %1388 = vrot.lane.b32.xlu0 %v4995_v36, %s3854_s15 }
 0x25f   :  { %1397 = vrot.lane.b32.xlu1 %v4995_v36, %s3858_s19 }
 0x260   :  { %1394 = vrot.lane.b32.xlu0 %v4995_v36, %s3857_s0 }
 0x267   :  { %1469 = vrot.lane.b32.xlu1 %v5041_v32, %s3856_s18 }
 0x299   :  { %v1335_v50 = vpop.permute.xlu2 %1334 }
 0x2a1   :  { %v1341_v34 = vpop.permute.xlu2 %1340 }
 0x2a9   :  { %v1383_v0 = vpop.permute.xlu2 %1382 }
 0x2b1   :  { %v1332_v2 = vpop.permute.xlu1 %1331  ;;  %v1392_v5 = vpop.permute.xlu2 %1391 }
 0x2b2   :  { %v1326_v44 = vpop.permute.xlu0 %1325 }
 0x2b3   :  { %v1346_v1 = vsel %vm1159_vm2, %v4982_v37, %v1326_v44 }
 0x2b9   :  { %v1344_v22 = vpop.permute.xlu1 %1343 }
 0x2ba   :  { %v1329_v3 = vpop.permute.xlu0 %1328 }
 0x2bb   :  { %v1347_v17 = vsel %vm713_vm0, %v1346_v1, %v1329_v3  ;;  %v3668_v3 = vld [vmem:[%s5516_s2 + $0x50] sm:$0xff] }
 0x2bc   :  { %v1349_v25 = vsel %vm1348_vm6, %v1347_v17, %v1332_v2 }
 0x2bd   :  { %v1351_v39 = vsel %vm1350_vm7, %v1349_v25, %v1335_v50  ;;  %v3669_v50 = vld [vmem:[%s5516_s2 + $0x58] sm:$0xff] }
 0x2c1   :  { %v1380_v41 = vpop.permute.xlu1 %1379 }
 0x2c2   :  { %v1338_v38 = vpop.permute.xlu0 %1337  ;;  %v1400_v29 = vsel %vm1159_vm2, %v4995_v36, %v1380_v41 }
 0x2c3   :  { %v1353_v24 = vsel %vm1352_vm8, %v1351_v39, %v1338_v38  ;;  %v1401_v63 = vsel %vm713_vm0, %v1400_v29, %v1383_v0  ;;  %v3667_v38 = vld [vmem:[%s5516_s2 + $0x48] sm:$0xff]  ;;  %v3678_v29 = vld [vmem:[%s5516_s2 + $0xa0] sm:$0xff] }
 0x2c4   :  { %v1355_v27 = vsel %vm1354_vm9, %v1353_v24, %v1341_v34  ;;  %v3785_v34 = vpack.i.bf16 %v5019_v23, %v5017_v60  ;;  %v3696_v24 = vld [vmem:[%s5516_s2 + $0x130] sm:$0xff] }
 0x2c5   :  { %v1357_v56 = vsel %vm1356_vm10, %v1355_v27, %v1344_v22  ;;  %v3702_v27 = vld [vmem:[%s5516_s2 + $0x160] sm:$0xff] }
 0x2c6   :  { %v1358_v26 = vperm.slane %v1357_v56, 1  ;;  %v3676_v56 = vld [vmem:[%s5516_s2 + $0x90] sm:$0xff] }
 0x2c8   :  { %v1362_v53 = vmul.f32 %v1358_v26, %v4817_v35  ;;  %v1366_v55 = vmul.f32 %v1358_v26, %v4839_v40  ;;  %v1360_v58 = vmul.f32 %v1358_v26, %v4828_v61  ;;  %v1364_v31 = vmul.f32 %v1358_v26, %v4833_v20  ;;  %v3672_v61 = vld [vmem:[%s5516_s2 + $0x70] sm:$0xff] }
 0x2c9   :  { %v1386_v42 = vpop.permute.xlu1 %1385  ;;  %v1370_v49 = vmul.f32 %v1358_v26, %v4858_v62  ;;  %v1368_v20 = vmul.f32 %v1358_v26, %v4851_v6  ;;  %v1372_v40 = vmul.f32 %v1358_v26, %v4863_v57  ;;  %1937 = vmatpush.bf16.msrb.mxu3 %v3672_v61  ;;  %v3671_v62 = vld [vmem:[%s5516_s2 + $0x68] sm:$0xff]  ;;  %v3670_v6 = vld [vmem:[%s5516_s2 + $0x60] sm:$0xff]  ;;  %v3790_v57 = vpack.i.bf16 %v5017_v60, %v5015_v48 }
 0x2ca   :  { %v1389_v28 = vpop.permute.xlu0 %1388  ;;  %v1402_v10 = vsel %vm1348_vm6, %v1401_v63, %v1386_v42  ;;  %v1374_v1 = vmul.f32 %v1358_v26, %v4868_v14  ;;  %v1376_v17 = vmul.f32 %v1358_v26, %v4882_v47  ;;  %v3666_v47 = vld [vmem:[%s5516_s2 + $0x40] sm:$0xff]  ;;  %v3688_v42 = vld [vmem:[%s5516_s2 + $0xf0] sm:$0xff]  ;;  %v3687_v63 = vld [vmem:[%s5516_s2 + $0xe8] sm:$0xff] }
 0x2cb   :  { %v1403_v37 = vsel %vm1350_vm7, %v1402_v10, %v1389_v28  ;;  %v3695_v28 = vld [vmem:[%s5516_s2 + $0x128] sm:$0xff]  ;;  %v3677_v10 = vld [vmem:[%s5516_s2 + $0x98] sm:$0xff] }
 0x2cc   :  { %v1404_v36 = vsel %vm1352_vm8, %v1403_v37, %v1392_v5  ;;  %v3686_v37 = vld [vmem:[%s5516_s2 + $0xe0] sm:$0xff]  ;;  %v3701_v26 = vld [vmem:[%s5516_s2 + $0x158] sm:$0xff] }
 0x2cd   :  { %1938 = vmatpush.bf16.msrb.mxu3 %v3671_v62  ;;  %v3693_v5 = vld [vmem:[%s5516_s2 + $0x118] sm:$0xff] }
 0x2d1   :  { %v1398_v16 = vpop.permute.xlu1 %1397  ;;  %1939 = vmatpush.bf16.msrb.mxu3 %v3670_v6 }
 0x2d2   :  { %v1395_v9 = vpop.permute.xlu0 %1394 }
 0x2d3   :  { %v1405_v21 = vsel %vm1354_vm9, %v1404_v36, %v1395_v9  ;;  %v3675_v9 = vld [vmem:[%s5516_s2 + $0x88] sm:$0xff]  ;;  %v3692_v36 = vld [vmem:[%s5516_s2 + $0x110] sm:$0xff] }
 0x2d4   :  { %v1406_v18 = vsel %vm1356_vm10, %v1405_v21, %v1398_v16  ;;  %v3685_v16 = vld [vmem:[%s5516_s2 + $0xd8] sm:$0xff]  ;;  %v3674_v21 = vld [vmem:[%s5516_s2 + $0x80] sm:$0xff] }
 0x2d5   :  { %v1407_v33 = vperm.slane %v1406_v18, 0  ;;  %1940 = vmatpush.bf16.msrb.mxu3 %v3669_v50  ;;  %v3684_v18 = vld [vmem:[%s5516_s2 + $0xd0] sm:$0xff] }
 0x2d7   :  { %v1411_v11 = vadd.f32 %v1407_v33, %v1362_v53  ;;  %v1415_v12 = vadd.f32 %v1407_v33, %v1366_v55  ;;  %v1409_v51 = vadd.f32 %v1407_v33, %v1360_v58  ;;  %v1413_v7 = vadd.f32 %v1407_v33, %v1364_v31  ;;  %v3700_v53 = vld [vmem:[%s5516_s2 + $0x150] sm:$0xff]  ;;  %v3691_v55 = vld [vmem:[%s5516_s2 + $0x108] sm:$0xff] }
 0x2d8   :  { %v1419_v8 = vadd.f32 %v1407_v33, %v1370_v49  ;;  %v1421_v2 = vadd.f32 %v1407_v33, %v1372_v40  ;;  %v1423_v41 = vadd.f32 %v1407_v33, %v1374_v1  ;;  %v1425_v25 = vadd.f32 %v1407_v33, %v1376_v17  ;;  %v3683_v58 = vld [vmem:[%s5516_s2 + $0xc8] sm:$0xff] }
 0x2d9   :  { %v3760_v43 = vpack.i.bf16 %v1415_v12, %v1411_v11  ;;  %v1539_v30 = vpack.c.bf16 %v1413_v7, %v1409_v51  ;;  %v3770_v59 = vpack.i.bf16 %v5041_v32, %v1415_v12  ;;  %v1417_v32 = vadd.f32 %v1407_v33, %v1368_v20  ;;  %1941 = vmatpush.bf16.msrb.mxu3 %v3668_v3 }
 0x2da   :  { %v3765_v35 = vpack.i.bf16 %v5008_v13, %v1419_v8  ;;  %v3681_v13 = vld [vmem:[%s5516_s2 + $0xb8] sm:$0xff]  ;;  %v3775_v44 = vpack.i.bf16 %v5010_v46, %v1419_v8  ;;  %v3800_v39 = vpack.i.bf16 %v5021_v4, %v1423_v41  ;;  %v3805_v0 = vpack.i.bf16 %v5023_v45, %v1425_v25  ;;  %v3682_v8 = vld [vmem:[%s5516_s2 + $0xc0] sm:$0xff] }
 0x2db   :  { %3761 = vrot.lane.b32.xlu2 %v3760_v43, %s3856_s18  ;;  %1926 = vmatmul.bf16.vlgmr.msrb.gmra.mxu2 %v1539_v30  ;;  %v3780_v52 = vpack.i.bf16 %v1421_v2, %v1417_v32  ;;  %v1545_v54 = vpack.c.bf16 %v1417_v32, %v1417_v32  ;;  %v3795_v22 = vpack.i.bf16 %v1417_v32, %v1413_v7  ;;  %v3697_v4 = vld [vmem:[%s5516_s2 + $0x138] sm:$0xff]  ;;  %v3690_v7 = vld [vmem:[%s5516_s2 + $0x100] sm:$0xff]  ;;  %v3699_v43 = vld [vmem:[%s5516_s2 + $0x148] sm:$0xff]  ;;  %v1470_v30 = vpop.permute.xlu1 %1469 }
 0x2dc   :  { %3771 = vrot.lane.b32.xlu1 %v3770_v59, %s3855_s16  ;;  %3766 = vrot.lane.b32.xlu0 %v3765_v35, %s3856_s18  ;;  %v3810_v14 = vpack.i.bf16 %v5019_v23, %v1421_v2  ;;  %v3679_v23 = vld [vmem:[%s5516_s2 + $0xa8] sm:$0xff]  ;;  %v3689_v45 = vld [vmem:[%s5516_s2 + $0xf8] sm:$0xff] }
 0x2dd   :  { %1954 = vmatpush.bf16.msra.mxu0 %v3681_v13  ;;  %1942 = vmatpush.bf16.msrb.mxu3 %v3667_v38 }
 0x2de   :  { %1990 = vmatpush.bf16.msra.mxu2 %v3697_v4  ;;  %1972 = vmatpush.bf16.msra.mxu1 %v3689_v45 }
 0x2e1   :  { %1943 = vmatpush.bf16.msrb.mxu3 %v3666_v47 }
 0x2e2   :  { %1991 = vmatpush.bf16.msra.mxu2 %v3696_v24  ;;  %1973 = vmatpush.bf16.msra.mxu1 %v3688_v42 }
 0x2e3   :  { %3776 = vrot.lane.b32.xlu2 %v3775_v44, %s3855_s16 }
 0x2e4   :  { %3791 = vrot.lane.b32.xlu1 %v3790_v57, %s3859_s20  ;;  %3781 = vrot.lane.b32.xlu0 %v3780_v52, %s3854_s15 }
 0x2e5   :  { %2011 = vmatpush.bf16.msra.mxu3 %v3702_v27 }
 0x2e6   :  { %1992 = vmatpush.bf16.msra.mxu2 %v3695_v28  ;;  %1974 = vmatpush.bf16.msra.mxu1 %v3687_v63 }
 0x2e9   :  { %2012 = vmatpush.bf16.msra.mxu3 %v3701_v26 }
 0x2ea   :  { %1993 = vmatpush.bf16.msra.mxu2 %v3694_v15  ;;  %1975 = vmatpush.bf16.msra.mxu1 %v3686_v37 }
 0x2eb   :  { %1931 = vmatmul.bf16.gmra.mxu2 %v1545_v54  ;;  %3796 = vrot.lane.b32.xlu2 %v3795_v22, %s3859_s20 }
 0x2ec   :  { %1505 = vrot.lane.b32.xlu1 %v5010_v46, %s3856_s18  ;;  %3786 = vrot.lane.b32.xlu0 %v3785_v34, %s3854_s15  ;;  %v3680_v46 = vld [vmem:[%s5516_s2 + $0xb0] sm:$0xff] }
 0x2ed   :  { %1955 = vmatpush.bf16.msra.mxu0 %v3680_v46  ;;  %2013 = vmatpush.bf16.msra.mxu3 %v3700_v53 }
 0x2ee   :  { %1994 = vmatpush.bf16.msra.mxu2 %v3693_v5  ;;  %1976 = vmatpush.bf16.msra.mxu1 %v3685_v16 }
 0x2f1   :  { %1956 = vmatpush.bf16.msra.mxu0 %v3679_v23  ;;  %2014 = vmatpush.bf16.msra.mxu3 %v3699_v43 }
 0x2f2   :  { %1995 = vmatpush.bf16.msra.mxu2 %v3692_v36  ;;  %1977 = vmatpush.bf16.msra.mxu1 %v3684_v18 }
 0x2f3   :  { %3801 = vrot.lane.b32.xlu2 %v3800_v39, %s3855_s16 }
 0x2f4   :  { %3806 = vrot.lane.b32.xlu0 %v3805_v0, %s3854_s15 }
 0x2f5   :  { %1957 = vmatpush.bf16.msra.mxu0 %v3678_v29 }
 0x2f6   :  { %1996 = vmatpush.bf16.msra.mxu2 %v3691_v55  ;;  %1978 = vmatpush.bf16.msra.mxu1 %v3683_v58 }
 0x2f9   :  { %1958 = vmatpush.bf16.msra.mxu0 %v3677_v10 }
 0x2fa   :  { %1997 = vmatpush.bf16.msra.mxu2 %v3690_v7  ;;  %1979 = vmatpush.bf16.msra.mxu1 %v3682_v8 }
 0x2fb   :  { %3811 = vrot.lane.b32.xlu2 %v3810_v14, %s3859_s20 }
 0x2fd   :  { %1959 = vmatpush.bf16.msra.mxu0 %v3676_v56 }
 0x301   :  { %1960 = vmatpush.bf16.msra.mxu0 %v3675_v9 }
 0x305   :  { %1961 = vmatpush.bf16.msra.mxu0 %v3674_v21 }
 0x335   :  { %v3762_v33 = vpop.permute.xlu2 %3761 }
 0x336   :  { %v3764_v31 = vunpack.i.h.bf16 %v3762_v33  ;;  %v3763_v49 = vunpack.i.l.bf16 %v3762_v33 }
 0x338   :  { %v1463_v11 = vsel %vm1159_vm2, %v5025_v19, %v3763_v49  ;;  %v1499_v12 = vsel %vm1159_vm2, %v5015_v48, %v3764_v31  ;;  %v3698_v48 = vld [vmem:[%s5516_s2 + $0x140] sm:$0xff]  ;;  %v1471_v32 = vsel %vm1159_vm2, %v3764_v31, %v1470_v30  ;;  %s2720_s2 = sshll.u32 %s5525_s11, 4  ;;  %s2721_s2 = int_to_ptr.hbm [resolvable:$true] %s2720_s2 }
 0x339   :  { %v1540_v51 = vpack.c.bf16 %v1499_v12, %v1463_v11  ;;  %2015 = vmatpush.bf16.msra.mxu3 %v3698_v48 }
 0x33b   :  { %1944 = vmatmul.bf16.vlgmr.msrb.gmra.mxu3 %v1540_v51 }
 0x33d   :  { %v3777_v19 = vpop.permute.xlu2 %3776 }
 0x33e   :  { %v3779_v22 = vunpack.i.h.bf16 %v3777_v19  ;;  %v3778_v3 = vunpack.i.l.bf16 %v3777_v19 }
 0x345   :  { %v3797_v59 = vpop.permute.xlu2 %3796 }
 0x346   :  { %v3799_v35 = vunpack.i.h.bf16 %v3797_v59  ;;  %v3798_v13 = vunpack.i.l.bf16 %v3797_v59 }
 0x348   :  { %v1500_v57 = vsel %vm713_vm0, %v1471_v32, %v3799_v35  ;;  %v2066_v32 = vld [vmem:[%s5519_s5 + $0x48] sm:$0xff] }
 0x34d   :  { %v3802_v2 = vpop.permute.xlu2 %3801 }
 0x34e   :  { %v3772_v61 = vpop.permute.xlu1 %3771  ;;  %v3767_v20 = vpop.permute.xlu0 %3766  ;;  %v3804_v53 = vunpack.i.h.bf16 %v3802_v2  ;;  %v3803_v33 = vunpack.i.l.bf16 %v3802_v2  ;;  %v2065_v2 = vld [vmem:[%s5519_s5 + $0x40] sm:$0xff] }
 0x34f   :  { %v3769_v40 = vunpack.i.h.bf16 %v3767_v20  ;;  %v3768_v62 = vunpack.i.l.bf16 %v3767_v20  ;;  %v3774_v34 = vunpack.i.h.bf16 %v3772_v61  ;;  %v3773_v1 = vunpack.i.l.bf16 %v3772_v61  ;;  %v2068_v61 = vld [vmem:[%s5519_s5 + $0x58] sm:$0xff] }
 0x350   :  { %v1523_v11 = vsel %vm1348_vm6, %v3803_v33, %v3804_v53  ;;  %2076 = vmatpush.msrb.mxu0 %v2068_v61 }
 0x351   :  { %v1433_v44 = vsel %vm1159_vm2, %v3763_v49, %v3769_v40  ;;  %v1535_v6 = vsel %vm1159_vm2, %v5017_v60, %v3768_v62  ;;  %v1487_v60 = vsel %vm1348_vm6, %v3778_v3, %v3779_v22  ;;  %v1451_v14 = vsel %vm1348_vm6, %v3773_v1, %v3774_v34  ;;  %v1641_v34 = vld [vmem:[%s5524_s10 + $0x3] ss:$0 sm:$0xff] }
 0x352   :  { %v1464_v52 = vsel %vm713_vm0, %v1433_v44, %v3798_v13  ;;  %v1546_v50 = vpack.c.bf16 %v1535_v6, %v1535_v6 }
 0x353   :  { %v1541_v54 = vpack.c.bf16 %v1500_v57, %v1464_v52 }
 0x354   :  { %1949 = vmatmul.bf16.gmra.mxu3 %v1546_v50  ;;  %v2064_v50 = vld [vmem:[%s5519_s5 + $0x38] sm:$0xff] }
 0x355   :  { %1962 = vmatmul.bf16.vlgmr.msra.gmra.mxu0 %v1541_v54  ;;  %v3812_v42 = vpop.permute.xlu2 %3811 }
 0x356   :  { %v3792_v17 = vpop.permute.xlu1 %3791  ;;  %v3782_v41 = vpop.permute.xlu0 %3781  ;;  %v3813_v28 = vunpack.i.l.bf16 %v3812_v42  ;;  %v3814_v16 = vunpack.i.h.bf16 %v3812_v42 }
 0x357   :  { %v3794_v38 = vunpack.i.h.bf16 %v3792_v17  ;;  %v3793_v25 = vunpack.i.l.bf16 %v3792_v17  ;;  %v3784_v39 = vunpack.i.h.bf16 %v3782_v41  ;;  %v3783_v0 = vunpack.i.l.bf16 %v3782_v41 }
 0x358   :  { %v1514_v55 = vsel %vm713_vm0, %v3813_v28, %v3814_v16 }
 0x359   :  { %v1478_v47 = vsel %vm713_vm0, %v3799_v35, %v3794_v38  ;;  %v1442_v46 = vsel %vm713_vm0, %v3798_v13, %v3793_v25  ;;  %v1502_v4 = vsel %vm1350_vm7, %v1487_v60, %v3784_v39  ;;  %v1466_v23 = vsel %vm1350_vm7, %v1451_v14, %v3783_v0  ;;  %v2067_v13 = vld [vmem:[%s5519_s5 + $0x50] sm:$0xff]  ;;  %v2061_v38 = vld [vmem:[%s5519_s5 + $0x20] sm:$0xff]  ;;  %v2060_v14 = vld [vmem:[%s5519_s5 + $0x18] sm:$0xff] }
 0x35a   :  { %v1501_v45 = vsel %vm1348_vm6, %v1478_v47, %v3778_v3  ;;  %v1465_v24 = vsel %vm1348_vm6, %v1442_v46, %v3773_v1  ;;  %v1543_v29 = vpack.c.bf16 %v1502_v4, %v1466_v23  ;;  %v1537_v12 = vsel %vm1348_vm6, %v1514_v55, %v3803_v33  ;;  %2077 = vmatpush.msrb.mxu0 %v2067_v13  ;;  %v2063_v3 = vld [vmem:[%s5519_s5 + $0x30] sm:$0xff]  ;;  %v2062_v1 = vld [vmem:[%s5519_s5 + $0x28] sm:$0xff] }
 0x35b   :  { %v1542_v27 = vpack.c.bf16 %v1501_v45, %v1465_v24  ;;  %v1548_v43 = vpack.c.bf16 %v1537_v12, %v1537_v12  ;;  %v2059_v47 = vld [vmem:[%s5519_s5 + $0x10] sm:$0xff]  ;;  %v2058_v24 = vld [vmem:[%s5519_s5 + $0x8] sm:$0xff] }
 0x35c   :  { %1998 = vmatmul.bf16.vlgmr.msra.gmra.mxu2 %v1543_v29  ;;  %2078 = vmatpush.msrb.mxu0 %v2066_v32 }
 0x35d   :  { %1980 = vmatmul.bf16.vlgmr.msra.gmra.mxu1 %v1542_v27  ;;  %v2057_v27 = vld [vmem:[%s5519_s5] sm:$0xff] }
 0x35e   :  { %v1506_v63 = vpop.permute.xlu1 %1505  ;;  %v3787_v10 = vpop.permute.xlu0 %3786  ;;  %2079 = vmatpush.msrb.mxu0 %v2065_v2 }
 0x35f   :  { %v1507_v15 = vsel %vm1159_vm2, %v3768_v62, %v1506_v63  ;;  %v3789_v56 = vunpack.i.h.bf16 %v3787_v10  ;;  %v3788_v37 = vunpack.i.l.bf16 %v3787_v10  ;;  %v1927_v26 = vpop.f32.mrf.mxu2 }
 0x360   :  { %v1536_v5 = vsel %vm713_vm0, %v1507_v15, %v3813_v28  ;;  %2080 = vmatpush.msrb.mxu0 %v2064_v50  ;;  %v1928_v17 = vadd.f32 %v1927_v26, %v1641_v34 }
 0x361   :  { %v1460_v9 = vsel %vm1350_vm7, %v3783_v0, %v3788_v37  ;;  %v1496_v36 = vsel %vm1350_vm7, %v3784_v39, %v3789_v56  ;;  %v1547_v18 = vpack.c.bf16 %v1536_v5, %v1536_v5 }
 0x362   :  { %v1544_v21 = vpack.c.bf16 %v1496_v36, %v1460_v9  ;;  %2081 = vmatpush.msrb.mxu0 %v2063_v3 }
 0x364   :  { %3352 = vmatmul.msk.bf16.vlgmr.msra.gmra.mxu3 %vm1352_vm8, %v1544_v21  ;;  %2082 = vmatpush.msrb.mxu0 %v2062_v1 }
 0x365   :  { %1967 = vmatmul.bf16.gmra.mxu0 %v1547_v18 }
 0x366   :  { %v3807_v58 = vpop.permute.xlu0 %3806  ;;  %2083 = vmatpush.msrb.mxu0 %v2061_v38 }
 0x367   :  { %v3808_v31 = vunpack.i.l.bf16 %v3807_v58  ;;  %v1929_v49 = vpop.f32.mrf.mxu2  ;;  %v3809_v8 = vunpack.i.h.bf16 %v3807_v58 }
 0x368   :  { %v1930_v41 = vadd.f32 %v1929_v49, %v1641_v34  ;;  %2084 = vmatpush.msrb.mxu0 %v2060_v14 }
 0x369   :  { %v1538_v51 = vsel %vm1350_vm7, %v1523_v11, %v3808_v31  ;;  %v1532_v19 = vsel %vm1350_vm7, %v3808_v31, %v3809_v8 }
 0x36a   :  { %v1549_v7 = vpack.c.bf16 %v1538_v51, %v1538_v51  ;;  %v1550_v30 = vpack.c.bf16 %v1532_v19, %v1532_v19  ;;  %2085 = vmatpush.msrb.mxu0 %v2059_v47 }
 0x36c   :  { %2003 = vmatmul.bf16.gmra.mxu2 %v1549_v7  ;;  %2086 = vmatpush.msrb.mxu0 %v2058_v24 }
 0x36d   :  { %1985 = vmatmul.bf16.gmra.mxu1 %v1548_v43 }
 0x36e   :  { %2087 = vmatpush.msrb.mxu0 %v2057_v27 }
 0x36f   :  { %v1932_v48 = vpop.f32.mrf.mxu2 }
 0x370   :  { %v1933_v28 = vadd.f32 %v1932_v48, %v1641_v34 }
 0x374   :  { %3353 = vmatmul.msk.bf16.gmra.mxu3 %vm1352_vm8, %v1550_v30 }
 0x377   :  { %v1934_v59 = vpop.f32.mrf.mxu2 }
 0x3be   :  { %v1945_v35 = vpop.f32.mrf.mxu3 }
 0x3bf   :  { %v1946_v0 = vadd.f32 %v1945_v35, %v1928_v17 }
 0x3c6   :  { %v1947_v20 = vpop.f32.mrf.mxu3 }
 0x3c7   :  { %v1948_v60 = vadd.f32 %v1947_v20, %v1930_v41 }
 0x3d2   :  { %v1963_v40 = vpop.f32.mrf.mxu0 }
 0x3d3   :  { %v1964_v46 = vadd.f32 %v1963_v40, %v1946_v0 }
 0x3d7   :  { %v1950_v62 = vpop.f32.mrf.mxu3 }
 0x3d8   :  { %v1951_v37 = vadd.f32 %v1950_v62, %v1933_v28  ;;  %v3718_v28 = vld [vmem:[%s5517_s3 + $0x78] sm:$0xff] }
 0x3d9   :  { %2314 = vmatpush.bf16.msrb.mxu2 %v3718_v28 }
 0x3da   :  { %v1965_v44 = vpop.f32.mrf.mxu0  ;;  %v1981_v6 = vpop.f32.mrf.mxu1 }
 0x3db   :  { %v1966_v4 = vadd.f32 %v1965_v44, %v1948_v60  ;;  %v1982_v29 = vadd.f32 %v1981_v6, %v1964_v46  ;;  %v2029_v46 = vld [vmem:[%s5524_s10 + $0x4] ss:$0 sm:$0xff] }
 0x3df   :  { %v1952_v57 = vpop.f32.mrf.mxu3  ;;  %v1999_v52 = vpop.f32.mrf.mxu2 }
 0x3e0   :  { %v2000_v63 = vadd.f32 %v1999_v52, %v1982_v29  ;;  %v2030_v29 = vld [vmem:[%s5524_s10 + $0x5] ss:$0 sm:$0xff] }
 0x3e2   :  { %v1968_v54 = vpop.f32.mrf.mxu0  ;;  %v1983_v22 = vpop.f32.mrf.mxu1 }
 0x3e3   :  { %v1984_v42 = vadd.f32 %v1983_v22, %v1966_v4  ;;  %v1969_v16 = vadd.f32 %v1968_v54, %v1951_v37 }
 0x3e7   :  { %v2001_v25 = vpop.f32.mrf.mxu2  ;;  %v2017_v39 = vpop.f32.mrf.mxu3 }
 0x3e8   :  { %v2002_v10 = vadd.f32 %v2001_v25, %v1984_v42  ;;  %v2018_v26 = vadd.f32 %v2017_v39, %v2000_v63  ;;  %v3720_v63 = vld [vmem:[%s5517_s3 + $0x88] sm:$0xff] }
 0x3e9   :  { %2333 = vmatpush.bf16.msrb.mxu3 %v3720_v63 }
 0x3ea   :  { %v1970_v23 = vpop.f32.mrf.mxu0  ;;  %v1986_v45 = vpop.f32.mrf.mxu1  ;;  %v5296_v21 = vmax.f32 %v2018_v26, 0.0 }
 0x3eb   :  { %v1987_v18 = vadd.f32 %v1986_v45, %v1969_v16 }
 0x3ec   :  { %v2042_v31 = vmul.f32 %v5296_v21, %v5296_v21  ;;  %v2031_v12 = vsel %vm1354_vm9, %v5296_v21, 0.0 }
 0x3ee   :  { %v2045_v43 = vsel %vm1354_vm9, %v2042_v31, 0.0 }
 0x3ef   :  { %v2004_v15 = vpop.f32.mrf.mxu2  ;;  %v2019_v56 = vpop.f32.mrf.mxu3 }
 0x3f0   :  { %v2020_v5 = vadd.f32 %v2019_v56, %v2002_v10  ;;  %v2005_v53 = vadd.f32 %v2004_v15, %v1987_v18  ;;  %v3710_v10 = vld [vmem:[%s5517_s3 + $0x38] sm:$0xff]  ;;  %v3717_v15 = vld [vmem:[%s5517_s3 + $0x70] sm:$0xff]  ;;  %v3719_v56 = vld [vmem:[%s5517_s3 + $0x80] sm:$0xff] }
 0x3f1   :  { %2301 = vmatpush.bf16.msrb.mxu1 %v3710_v10  ;;  %2315 = vmatpush.bf16.msrb.mxu2 %v3717_v15 }
 0x3f2   :  { %v5294_v9 = vmax.f32 %v2020_v5, 0.0  ;;  %v1988_v36 = vpop.f32.mrf.mxu1  ;;  %2334 = vmatpush.bf16.msrb.mxu3 %v3719_v56 }
 0x3f4   :  { %v2043_v33 = vmul.f32 %v5294_v9, %v5294_v9  ;;  %v2032_v49 = vsel %vm1354_vm9, %v5294_v9, 0.0 }
 0x3f5   :  { %v2033_v8 = vadd.f32 %v2032_v49, %v2031_v12 }
 0x3f6   :  { %v2046_v51 = vsel %vm1354_vm9, %v2043_v33, 0.0 }
 0x3f7   :  { %v2006_v55 = vpop.f32.mrf.mxu2  ;;  %v2022_v58 = vpop.f32.mrf.mxu3  ;;  %v2047_v30 = vadd.f32 %v2046_v51, %v2045_v43  ;;  %v3709_v43 = vld [vmem:[%s5517_s3 + $0x30] sm:$0xff] }
 0x3f8   :  { %v2023_v11 = vadd.f32 %v2022_v58, %v2005_v53  ;;  %2302 = vmatpush.bf16.msrb.mxu1 %v3709_v43  ;;  %v3738_v43 = vld [vmem:[%s5521_s7 + $0x8] sm:$0xff] }
 0x3fa   :  { %v5307_v7 = vmax.f32 %v2023_v11, 0.0 }
 0x3fc   :  { %v2034_v19 = vsel %vm1354_vm9, %v5307_v7, 0.0  ;;  %v2044_v48 = vmul.f32 %v5307_v7, %v5307_v7 }
 0x3fd   :  { %v2035_v59 = vadd.f32 %v2034_v19, %v2033_v8  ;;  %v3707_v19 = vld [vmem:[%s5517_s3 + $0x20] sm:$0xff] }
 0x3fe   :  { %v2048_v35 = vsel %vm1354_vm9, %v2044_v48, 0.0  ;;  %v3714_v48 = vld [vmem:[%s5517_s3 + $0x58] sm:$0xff] }
 0x3ff   :  { %v2036_v61 = vrot.slane %v2035_v59, 4  ;;  %v2049_v20 = vadd.f32 %v2048_v35, %v2047_v30  ;;  %v2024_v40 = vpop.f32.mrf.mxu3  ;;  %v3706_v30 = vld [vmem:[%s5517_s3 + $0x18] sm:$0xff]  ;;  %v3705_v35 = vld [vmem:[%s5517_s3 + $0x10] sm:$0xff] }
 0x400   :  { %v3711_v40 = vld [vmem:[%s5517_s3 + $0x40] sm:$0xff] }
 0x401   :  { %v2037_v62 = vadd.f32 %v2036_v61, %v2035_v59  ;;  %v2050_v13 = vrot.slane %v2049_v20, 4  ;;  %v3713_v59 = vld [vmem:[%s5517_s3 + $0x50] sm:$0xff]  ;;  %v3712_v61 = vld [vmem:[%s5517_s3 + $0x48] sm:$0xff] }
 0x403   :  { %v2038_v32 = vrot.slane %v2037_v62, 2  ;;  %v2051_v2 = vadd.f32 %v2050_v13, %v2049_v20  ;;  %v3704_v20 = vld [vmem:[%s5517_s3 + $0x8] sm:$0xff] }
 0x405   :  { %v2039_v44 = vadd.f32 %v2038_v32, %v2037_v62  ;;  %v2052_v6 = vrot.slane %v2051_v2, 2  ;;  %v3703_v62 = vld [vmem:[%s5517_s3] sm:$0xff] }
 0x407   :  { %v2040_v57 = vrot.slane %v2039_v44, 1  ;;  %v2053_v52 = vadd.f32 %v2052_v6, %v2051_v2 }
 0x409   :  { %v2054_v50 = vrot.slane %v2053_v52, 1  ;;  %v2041_v54 = vadd.f32 %v2040_v57, %v2039_v44 }
 0x40b   :  { %v2055_v22 = vadd.f32 %v2054_v50, %v2053_v52 }
 0x40d   :  { %v2056_v3 = vsel %vm1238_vm1, %v2041_v54, %v2055_v22  ;;  %v3728_v54 = vld [vmem:[%s5520_s6 + $0x38] sm:$0xff] }
 0x40e   :  { %3354 = vmatmul.msk.f32.vlgmr.msrb.gmra.mxu0 %vm1354_vm9, %v2056_v3  ;;  %v3736_v22 = vld [vmem:[%s5520_s6 + $0x78] sm:$0xff]  ;;  %v3727_v3 = vld [vmem:[%s5520_s6 + $0x30] sm:$0xff] }
 0x40f   :  { %2485 = vmatpush.bf16.msra.mxu0 %v3728_v54 }
 0x413   :  { %2486 = vmatpush.bf16.msra.mxu0 %v3727_v3 }
 0x48b   :  { %v2089_v34 = vpop.f32.mrf.mxu0 }
 0x48c   :  { %v2092_v1 = vmul.f32 0.013888889, %v2089_v34  ;;  %v3735_v34 = vld [vmem:[%s5520_s6 + $0x70] sm:$0xff] }
 0x48e   :  { %v2093_v17 = vmul.f32 %v2092_v1, %v2092_v1 }
 0x490   :  { %v2095_v41 = vrot.slane %v2093_v17, 7  ;;  %v3726_v17 = vld [vmem:[%s5520_s6 + $0x28] sm:$0xff] }
 0x491   :  { %2487 = vmatpush.bf16.msra.mxu0 %v3726_v17 }
 0x492   :  { %v2097_v38 = vsub.f32 %v2092_v1, %v2095_v41  ;;  %v3734_v41 = vld [vmem:[%s5520_s6 + $0x68] sm:$0xff] }
 0x494   :  { %v2098_v25 = vadd.f32 1e-05, %v2097_v38  ;;  %v3725_v38 = vld [vmem:[%s5520_s6 + $0x20] sm:$0xff] }
 0x495   :  { %2488 = vmatpush.bf16.msra.mxu0 %v3725_v38 }
 0x496   :  { %3822 = vrsqrt.f32 %v2098_v25  ;;  %vm2105_vm12 = vweird.f32 %v2098_v25 }
 0x49c   :  { %v3823_v39 = vpop.eup %3822 }
 0x49d   :  { %v2100_v0 = vmul.f32 %v3823_v39, %v2098_v25  ;;  %vm2106_vm11 = vweird.f32 %v3823_v39  ;;  %v3733_v25 = vld [vmem:[%s5520_s6 + $0x60] sm:$0xff] }
 0x49e   :  { %vm2107_vm13 = vmor %vm2105_vm12, %vm2106_vm11 }
 0x49f   :  { %v2101_v60 = vmul.f32 %v3823_v39, %v2100_v0  ;;  %v3732_v0 = vld [vmem:[%s5520_s6 + $0x58] sm:$0xff] }
 0x4a1   :  { %v2102_v14 = vmul.f32 0.5, %v2101_v60 }
 0x4a3   :  { %v2103_v47 = vsub.f32 1.5, %v2102_v14  ;;  %v2189_v14 = vld [vmem:[%s5524_s10 + $0x6] ss:$0 sm:$0xff] }
 0x4a5   :  { %v2104_v4 = vmul.f32 %v3823_v39, %v2103_v47  ;;  %v3723_v47 = vld [vmem:[%s5520_s6 + $0x10] sm:$0xff] }
 0x4a7   :  { %v2108_v23 = vsel %vm2107_vm13, %v3823_v39, %v2104_v4  ;;  %v3724_v39 = vld [vmem:[%s5520_s6 + $0x18] sm:$0xff] }
 0x4a8   :  { %v2109_v45 = vmul.f32 %v2108_v23, %v2029_v46  ;;  %2489 = vmatpush.bf16.msra.mxu0 %v3724_v39  ;;  %v3731_v46 = vld [vmem:[%s5520_s6 + $0x50] sm:$0xff] }
 0x4a9   :  { %v3747_v39 = vld [vmem:[%s5522_s8 + $0x10] sm:$0xff] }
 0x4aa   :  { %v2111_v24 = vrot.slane %v2109_v45, 1  ;;  %2118 = vrot.lane.b32.xlu1 %v2109_v45, %s3854_s15  ;;  %2115 = vrot.lane.b32.xlu0 %v2109_v45, %s3859_s20 }
 0x4ac   :  { %v2113_v42 = vmul.f32 %v2111_v24, %v2092_v1  ;;  %2490 = vmatpush.bf16.msra.mxu0 %v3723_v47  ;;  %v3722_v24 = vld [vmem:[%s5520_s6 + $0x8] sm:$0xff] }
 0x4ae   :  { %v2114_v27 = vsub.f32 %v2030_v29, %v2113_v42  ;;  %v3730_v29 = vld [vmem:[%s5520_s6 + $0x48] sm:$0xff] }
 0x4b0   :  { %2128 = vrot.lane.b32.xlu2 %v2114_v27, %s3859_s20  ;;  %2491 = vmatpush.bf16.msra.mxu0 %v3722_v24  ;;  %s3862_s20 = smov [#allocation2]  }
 0x4b1   :  { %s2718_s17 = sshll.u32 %s3862_s20, 4  ;;  %s2719_s17 = int_to_ptr.vmem [resolvable:$true] %s2718_s17 }
 0x4b2   :  { %2131 = vrot.lane.b32.xlu0 %v2114_v27, %s3854_s15 }
 0x50a   :  { %v2129_v36 = vpop.permute.xlu2 %2128 }
 0x50b   :  { %v2134_v53 = vsel %vm713_vm0, %v2114_v27, %v2129_v36  ;;  %v3742_v36 = vld [vmem:[%s5521_s7 + $0x28] sm:$0xff] }
 0x51c   :  { %v2119_v37 = vpop.permute.xlu1 %2118  ;;  %v2116_v26 = vpop.permute.xlu0 %2115 }
 0x51d   :  { %v2121_v5 = vsel %vm713_vm0, %v2109_v45, %v2116_v26  ;;  %v3729_v26 = vld [vmem:[%s5520_s6 + $0x40] sm:$0xff] }
 0x51e   :  { %v2122_v16 = vsel %vm1350_vm7, %v2121_v5, %v2119_v37  ;;  %v3721_v37 = vld [vmem:[%s5520_s6] sm:$0xff]  ;;  %v3744_v5 = vld [vmem:[%s5521_s7 + $0x38] sm:$0xff] }
 0x51f   :  { %v2123_v18 = vperm.slane %v2122_v16, 1  ;;  %2492 = vmatpush.bf16.msra.mxu0 %v3721_v37  ;;  %v3743_v16 = vld [vmem:[%s5521_s7 + $0x30] sm:$0xff] }
 0x521   :  { %v2126_v31 = vmul.f32 %v2123_v18, %v5307_v7  ;;  %v2125_v49 = vmul.f32 %v2123_v18, %v5294_v9  ;;  %v2124_v11 = vmul.f32 %v2123_v18, %v5296_v21  ;;  %v3716_v7 = vld [vmem:[%s5517_s3 + $0x68] sm:$0xff]  ;;  %v3715_v21 = vld [vmem:[%s5517_s3 + $0x60] sm:$0xff] }
 0x522   :  { %v3708_v9 = vld [vmem:[%s5517_s3 + $0x28] sm:$0xff]  ;;  %2316 = vmatpush.bf16.msrb.mxu2 %v3716_v7  ;;  %v3741_v18 = vld [vmem:[%s5521_s7 + $0x20] sm:$0xff] }
 0x523   :  { %2303 = vmatpush.bf16.msrb.mxu1 %v3708_v9  ;;  %v3737_v7 = vld [vmem:[%s5521_s7] sm:$0xff] }
 0x524   :  { %v2132_v33 = vpop.permute.xlu0 %2131  ;;  %v2388_v9 = vld [vmem:[%s5524_s10 + $0x7] ss:$0 sm:$0xff] }
 0x525   :  { %v2135_v55 = vsel %vm1350_vm7, %v2134_v53, %v2132_v33  ;;  %v3740_v53 = vld [vmem:[%s5521_s7 + $0x18] sm:$0xff]  ;;  %v3739_v33 = vld [vmem:[%s5521_s7 + $0x10] sm:$0xff] }
 0x526   :  { %v2136_v58 = vperm.slane %v2135_v55, 0  ;;  %2317 = vmatpush.bf16.msrb.mxu2 %v3715_v21 }
 0x527   :  { %2304 = vmatpush.bf16.msrb.mxu1 %v3707_v19 }
 0x528   :  { %v2139_v12 = vadd.f32 %v2136_v58, %v2126_v31  ;;  %v2138_v51 = vadd.f32 %v2136_v58, %v2125_v49  ;;  %v2137_v8 = vadd.f32 %v2136_v58, %v2124_v11 }
 0x52a   :  { %2145 = vrot.lane.b32.xlu2 %v2139_v12, %s3854_s15  ;;  %2141 = vrot.lane.b32.xlu1 %v2138_v51, %s3857_s0 }
 0x52b   :  { %2318 = vmatpush.bf16.msrb.mxu2 %v3714_v48  ;;  %2305 = vmatpush.bf16.msrb.mxu1 %v3706_v30 }
 0x52f   :  { %2319 = vmatpush.bf16.msrb.mxu2 %v3713_v59  ;;  %2306 = vmatpush.bf16.msrb.mxu1 %v3705_v35 }
 0x533   :  { %2320 = vmatpush.bf16.msrb.mxu2 %v3712_v61  ;;  %2307 = vmatpush.bf16.msrb.mxu1 %v3704_v20 }
 0x537   :  { %2321 = vmatpush.bf16.msrb.mxu2 %v3711_v40  ;;  %2308 = vmatpush.bf16.msrb.mxu1 %v3703_v62  ;;  %v2529_v40 = vld [vmem:[%s5524_s10 + $0x10] ss:$0 sm:$0xff] }
 0x53b   :  { %2498 = vmatpush.bf16.msra.mxu1 %v3736_v22  ;;  %2578 = vmatpush.bf16.msra.mxu2 %v3744_v5 }
 0x53f   :  { %2499 = vmatpush.bf16.msra.mxu1 %v3735_v34  ;;  %2579 = vmatpush.bf16.msra.mxu2 %v3743_v16  ;;  %v2635_v16 = vld [vmem:[%s5524_s10 + $0x13] ss:$0 sm:$0xff] }
 0x543   :  { %2500 = vmatpush.bf16.msra.mxu1 %v3734_v41  ;;  %2580 = vmatpush.bf16.msra.mxu2 %v3742_v36 }
 0x547   :  { %2501 = vmatpush.bf16.msra.mxu1 %v3733_v25  ;;  %2581 = vmatpush.bf16.msra.mxu2 %v3741_v18  ;;  %v3748_v25 = vld [vmem:[%s5522_s8 + $0x18] sm:$0xff] }
 0x548   :  { %2667 = vmatpush.bf16.msra.mxu3 %v3748_v25 }
 0x54b   :  { %2502 = vmatpush.bf16.msra.mxu1 %v3732_v0  ;;  %2582 = vmatpush.bf16.msra.mxu2 %v3740_v53  ;;  %v3746_v0 = vld [vmem:[%s5522_s8 + $0x8] sm:$0xff] }
 0x54c   :  { %2668 = vmatpush.bf16.msra.mxu3 %v3747_v39 }
 0x54f   :  { %2503 = vmatpush.bf16.msra.mxu1 %v3731_v46  ;;  %2583 = vmatpush.bf16.msra.mxu2 %v3739_v33 }
 0x550   :  { %2669 = vmatpush.bf16.msra.mxu3 %v3746_v0 }
 0x553   :  { %2504 = vmatpush.bf16.msra.mxu1 %v3730_v29  ;;  %2584 = vmatpush.bf16.msra.mxu2 %v3738_v43 }
 0x557   :  { %2505 = vmatpush.bf16.msra.mxu1 %v3729_v26  ;;  %2585 = vmatpush.bf16.msra.mxu2 %v3737_v7 }
 0x584   :  { %v2146_v13 = vpop.permute.xlu2 %2145 }
 0x585   :  { %v2152_v32 = vpack.c.bf16 %v2146_v13, %v2146_v13 }
 0x587   :  { %3427 = vmatmul.msk.bf16.vlgmr.msrb.gmra.mxu3 %vm713_vm0, %v2152_v32 }
 0x59c   :  { %v2142_v2 = vpop.permute.xlu1 %2141 }
 0x59d   :  { %v2148_v44 = vsel %vm1354_vm9, %v2137_v8, %v2142_v2  ;;  %v2149_v6 = vsel %vm1350_vm7, %v2142_v2, %v2146_v13 }
 0x59e   :  { %v2150_v57 = vpack.c.bf16 %v2148_v44, %v2148_v44  ;;  %v2151_v52 = vpack.c.bf16 %v2149_v6, %v2149_v6  ;;  %v3861_v6 = vmov 64.0  }
 0x59f   :  { %3824 = vrcp.f32 %v3861_v6 }
 0x5a0   :  { %2309 = vmatmul.bf16.vlgmr.msrb.gmra.mxu1 %v2150_v57  ;;  %2322 = vmatmul.bf16.vlgmr.msrb.gmra.mxu2 %v2151_v52 }
 0x5a5   :  { %v3825_v57 = vpop.eup %3824 }
 0x5a6   :  { %v2597_v52 = vmul.f32 64.0, %v3825_v57  ;;  %vm2601_vm15 = vweird.f32 %v3825_v57 }
 0x60a   :  { %v2336_v50 = vpop.f32.mrf.mxu3 }
 0x612   :  { %v2338_v1 = vpop.f32.mrf.mxu3 }
 0x61d   :  { %v2310_v60 = vpop.f32.mrf.mxu1 }
 0x61e   :  { %v2311_v4 = vadd.f32 %v2310_v60, %v2189_v14  ;;  %v3745_v60 = vld [vmem:[%s5522_s8] sm:$0xff]  ;;  %v3750_v14 = vld [vmem:[%s5523_s9 + $0x8] sm:$0xff] }
 0x61f   :  { %2670 = vmatpush.bf16.msra.mxu3 %v3745_v60 }
 0x623   :  { %v2323_v23 = vpop.f32.mrf.mxu2  ;;  %2704 = vmatpush.bf16.msrb.mxu3 %v3750_v14 }
 0x624   :  { %v2324_v45 = vadd.f32 %v2323_v23, %v2311_v4  ;;  %v3749_v4 = vld [vmem:[%s5523_s9] sm:$0xff] }
 0x625   :  { %v2312_v42 = vpop.f32.mrf.mxu1 }
 0x626   :  { %v2337_v27 = vadd.f32 %v2336_v50, %v2324_v45  ;;  %v2598_v50 = vsub.f32 1.0, %v2597_v52 }
 0x627   :  { %2705 = vmatpush.bf16.msrb.mxu3 %v3749_v4 }
 0x628   :  { %v2340_v28 = vmax.f32 %v2337_v27, 0.0  ;;  %v2599_v54 = vmul.f32 %v3825_v57, %v2598_v50 }
 0x62a   :  { %v2342_v63 = vrot.slane %v2340_v28, 2  ;;  %v2348_v10 = vrot.slane %v2340_v28, 6  ;;  %v2346_v58 = vrot.slane %v2340_v28, 4  ;;  %v2600_v22 = vadd.f32 %v3825_v57, %v2599_v54 }
 0x62b   :  { %v2325_v15 = vpop.f32.mrf.mxu2 }
 0x62c   :  { %v3815_v56 = vpack.i.bf16 %v2348_v10, %v2342_v63  ;;  %v2602_v3 = vsel %vm2601_vm15, %v3825_v57, %v2600_v22  ;;  %v2622_v63 = vld [vmem:[%s5524_s10 + $0x11] ss:$0 sm:$0xff] }
 0x62e   :  { %3816 = vrot.lane.b32.xlu0 %v3815_v56, %s3854_s15  ;;  %v2624_v56 = vld [vmem:[%s5524_s10 + $0x12] ss:$0 sm:$0xff] }
 0x6a0   :  { %v3817_v55 = vpop.permute.xlu0 %3816 }
 0x6a1   :  { %v3819_v31 = vunpack.i.h.bf16 %v3817_v55  ;;  %v3818_v49 = vunpack.i.l.bf16 %v3817_v55 }
 0x6a3   :  { %v2353_v11 = vsel %vm1350_vm7, %v2346_v58, %v3819_v31  ;;  %v2352_v12 = vsel %vm1350_vm7, %v2340_v28, %v3818_v49  ;;  %v2682_v58 = vld [vmem:[%s5524_s10 + $0x14] ss:$0 sm:$0xff] }
 0x6a4   :  { %v2355_v51 = vpack.c.bf16 %v2353_v11, %v2353_v11  ;;  %v2354_v8 = vpack.c.bf16 %v2352_v12, %v2352_v12 }
 0x6a6   :  { %2493 = vmatmul.bf16.vlgmr.msra.gmra.mxu0 %v2354_v8  ;;  %2506 = vmatmul.bf16.vlgmr.msra.gmra.mxu1 %v2355_v51 }
 0x723   :  { %v2494_v21 = vpop.f32.mrf.mxu0  ;;  %v2507_v19 = vpop.f32.mrf.mxu1 }
 0x724   :  { %v2495_v48 = vadd.f32 %v2494_v21, %v2388_v9 }
 0x726   :  { %v2508_v30 = vadd.f32 %v2507_v19, %v2495_v48 }
 0x728   :  { %v2511_v59 = vmax.f32 %v2508_v30, 0.0 }
 0x72a   :  { %v2512_v35 = vpack.c.bf16 %v2511_v59, %v2511_v59 }
 0x72b   :  { %v2496_v61 = vpop.f32.mrf.mxu0  ;;  %v2509_v20 = vpop.f32.mrf.mxu1 }
 0x72c   :  { %2586 = vmatmul.bf16.vlgmr.msra.gmra.mxu2 %v2512_v35 }
 0x7af   :  { %v2587_v62 = vpop.f32.mrf.mxu2 }
 0x7b0   :  { %v2588_v13 = vadd.f32 %v2587_v62, %v2529_v40 }
 0x7b2   :  { %v2591_v32 = vmax.f32 %v2588_v13, 0.0 }
 0x7b4   :  { %v2593_v2 = vsel %vm2592_vm14, %v2591_v32, 0.0 }
 0x7b5   :  { %2594 = vadd.xlane.f32.xlu1 %v2593_v2 }
 0x7b7   :  { %v2589_v44 = vpop.f32.mrf.mxu2 }
 0x828   :  { %v2595_v34 = vpop.xlane.xlu1 %2594 }
 0x829   :  { %v2603_v1 = vmul.f32 %v2602_v3, %v2595_v34 }
 0x82b   :  { %v2604_v17 = vsub.f32 %v2591_v32, %v2603_v1 }
 0x82d   :  { %v2605_v41 = vmul.f32 %v2604_v17, %v2604_v17 }
 0x82f   :  { %v2606_v38 = vsel %vm2592_vm14, %v2605_v41, 0.0 }
 0x830   :  { %2607 = vadd.xlane.f32.xlu2 %v2606_v38 }
 0x8a3   :  { %v2608_v47 = vpop.xlane.xlu2 %2607 }
 0x8a4   :  { %v2609_v46 = vmul.f32 %v2608_v47, %v2602_v3 }
 0x8a6   :  { %v2610_v23 = vadd.f32 1e-05, %v2609_v46 }
 0x8a8   :  { %3826 = vrsqrt.f32 %v2610_v23  ;;  %vm2617_vm2 = vweird.f32 %v2610_v23 }
 0x8ae   :  { %v3827_v45 = vpop.eup %3826 }
 0x8af   :  { %v2612_v24 = vmul.f32 %v3827_v45, %v2610_v23  ;;  %vm2618_vm1 = vweird.f32 %v3827_v45 }
 0x8b0   :  { %vm2619_vm3 = vmor %vm2617_vm2, %vm2618_vm1 }
 0x8b1   :  { %v2613_v29 = vmul.f32 %v3827_v45, %v2612_v24 }
 0x8b3   :  { %v2614_v42 = vmul.f32 0.5, %v2613_v29 }
 0x8b5   :  { %v2615_v27 = vsub.f32 1.5, %v2614_v42 }
 0x8b7   :  { %v2616_v28 = vmul.f32 %v3827_v45, %v2615_v27 }
 0x8b9   :  { %v2620_v10 = vsel %vm2619_vm3, %v3827_v45, %v2616_v28 }
 0x8ba   :  { %v2621_v15 = vmul.f32 %v2620_v10, %v2604_v17 }
 0x8bc   :  { %v2623_v37 = vmul.f32 %v2622_v63, %v2621_v15 }
 0x8be   :  { %v2625_v26 = vadd.f32 %v2624_v56, %v2623_v37 }
 0x8c0   :  { %v2626_v5 = vpack.c.bf16 %v2625_v26, %v2625_v26 }
 0x8c2   :  { %3540 = vmatmul.msk.bf16.vlgmr.msra.gmra.mxu3 %vm1350_vm7, %v2626_v5 }
 0x945   :  { %v2672_v36 = vpop.f32.mrf.mxu3 }
 0x946   :  { %v2673_v18 = vadd.f32 %v2672_v36, %v2635_v16 }
 0x948   :  { %v2676_v53 = vmax.f32 %v2673_v18, 0.0 }
 0x94a   :  { %v2677_v33 = vpack.c.bf16 %v2676_v53, %v2676_v53 }
 0x94c   :  { %3549 = vmatmul.msk.bf16.vlgmr.msrb.gmra.mxu3 %vm713_vm0, %v2677_v33 }
 0x94d   :  { %v2674_v55 = vpop.f32.mrf.mxu3 }
 0x9cf   :  { %v2707_v31 = vpop.f32.mrf.mxu3 }
 0x9d0   :  { %v2708_v49 = vadd.f32 %v2707_v31, %v2682_v58 }
 0x9d2   :  { %2712 = vst.msk [vmem:[#allocation2] sm:$0x3] %vm2711_vm4, %v2708_v49 }
 0x9d3   :  { %2723 = dma.vmem_to_hbm [thread:$0]  %s2719_s17, 32, %s2721_s2, [#allocation3]  }
 0x9d7   :  { %v2709_v11 = vpop.f32.mrf.mxu3 }
 0x9d8   :  { %3852 = dma.done.wait [#allocation3], 32  }
 0x9d9   :  { %3853 = vsyncadd [#allocation3], 4294967264 }
 0x9da   :  { %2728 = vsyncpa [#allocation3], 1 }

</bundles_post_ra>
